<compile_context>
chip_gen: v6e
topology: v6e:2x2x1
jax: 0.10.0
libtpu: 0.0.40
codegen_flags: <defaults>
</compile_context>

<pallas_src>
import numpy as np
import jax
import jax.numpy as jnp
from jax import lax
from jax.experimental import pallas as pl
from jax.experimental.pallas import tpu as pltpu

DIL = 4          # dilation / padding of the 3x3 convs inside SpatialGate
N_LOCAL = 8      # 2 ** halving  (halving = 3 in the module)
# kernel-tap offsets (dh, dw) for a 3x3 conv with dilation 4, row-major order
OFFSETS = [(DIL * (i - 1), DIL * (j - 1)) for i in range(3) for j in range(3)]


# ----------------------------------------------------------------------------- params
def init_spatial_gate_params(key, gate_channel):
    """Synthetic Conv/BN parameters matching the PyTorch SpatialGate layer shapes."""
    cr = gate_channel // 16
    ks = jax.random.split(key, 16)

    def bn_params(k):
        k1, k2, k3, k4 = jax.random.split(k, 4)
        gamma = 1.0 + 0.1 * jax.random.normal(k1, (cr,), jnp.float32)
        beta = 0.1 * jax.random.normal(k2, (cr,), jnp.float32)
        mean = 0.1 * jax.random.normal(k3, (cr,), jnp.float32)
        var = 0.5 + jax.random.uniform(k4, (cr,), jnp.float32)
        return (gamma, beta, mean, var)

    return {
        "w_red": 0.2 * jax.random.normal(ks[0], (cr, gate_channel, 1, 1), jnp.float32),
        "b_red": 0.1 * jax.random.normal(ks[1], (cr,), jnp.float32),
        "bn_red": bn_params(ks[2]),
        "w_d0": 0.2 * jax.random.normal(ks[3], (cr, cr, 3, 3), jnp.float32),
        "b_d0": 0.1 * jax.random.normal(ks[4], (cr,), jnp.float32),
        "bn_d0": bn_params(ks[5]),
        "w_d1": 0.2 * jax.random.normal(ks[6], (cr, cr, 3, 3), jnp.float32),
        "b_d1": 0.1 * jax.random.normal(ks[7], (cr,), jnp.float32),
        "bn_d1": bn_params(ks[8]),
        "w_fin": 0.2 * jax.random.normal(ks[9], (1, cr, 1, 1), jnp.float32),
        "b_fin": 0.1 * jax.random.normal(ks[10], (1,), jnp.float32),
    }


def fold_bn_into_conv(w, b, gamma, beta, mean, var, eps=1e-5):
    """Eval-mode BatchNorm folded into the preceding conv."""
    scale = gamma / jnp.sqrt(var + eps)
    return w * scale[:, None, None, None], (b - mean) * scale + beta


def pack_gate(p):
    """Fold BN into convs; return per-layer weight matrices.

    * reduce 1x1:   (cr, C) weight + (cr,) bias (bias added post-matmul in-kernel)
    * dilated 3x3:  (cr, 9*cr + 1) im2col-reordered weight with bias as last column
    * final 1x1:    (1, cr + 1) weight with bias as last column
    """
    w_red, b_red = fold_bn_into_conv(p["w_red"], p["b_red"], *p["bn_red"])
    w_d0, b_d0 = fold_bn_into_conv(p["w_d0"], p["b_d0"], *p["bn_d0"])
    w_d1, b_d1 = fold_bn_into_conv(p["w_d1"], p["b_d1"], *p["bn_d1"])
    cr, c_in = w_red.shape[0], w_red.shape[1]

    def dil_mat(w, b):
        co, ci = w.shape[0], w.shape[1]
        # (co, ci, kh, kw) -> (co, kh, kw, ci) -> (co, 9*ci); column (kh*3+kw)*ci + c
        m = jnp.transpose(w, (0, 2, 3, 1)).reshape(co, 9 * ci)
        return jnp.concatenate([m, b[:, None]], axis=1)                         # (co, 9ci+1)

    m_red = w_red.reshape(cr, c_in)                                             # (cr, C)
    m_fin = jnp.concatenate([p["w_fin"].reshape(1, cr), p["b_fin"][:, None]], axis=1)
    return (m_red, b_red), dil_mat(w_d0, b_d0), dil_mat(w_d1, b_d1), m_fin


def build_masks(H, W, Hc, nb):
    """Shift-validity masks (global & per-chunk) and 0/1 chunk-membership masks."""
    hw = H * W
    L = nb * hw
    j = np.arange(L)
    h = (j % hw) // W
    w = j % W
    hl = h % Hc
    mg = np.stack([((h + dh >= 0) & (h + dh < H) & (w + dw >= 0) & (w + dw < W))
                   .astype(np.float32) for dh, dw in OFFSETS])
    ml = np.stack([((hl + dh >= 0) & (hl + dh < Hc) & (w + dw >= 0) & (w + dw < W))
                   .astype(np.float32) for dh, dw in OFFSETS])
    cm = np.stack([(h // Hc == i).astype(np.float32) for i in range(N_LOCAL)])
    shifts = [dh * W + dw for dh, dw in OFFSETS]
    return jnp.asarray(mg), jnp.asarray(ml), jnp.asarray(cm), shifts


def choose_nb(n, hw, target_lanes=1024):
    """Batch elements per grid step: widen lanes without dropping below 2 grid steps."""
    best = 1
    for nb in range(1, n + 1):
        if n % nb == 0 and nb * hw <= target_lanes and (n // nb >= 2 or n <= 1):
            best = nb
    return best


# ----------------------------------------------------------------------------- kernel
def make_kernel(cr, L, shifts):
    padl = max(abs(s) for s in shifts)   # 4*W + 4

    def build_fcol(f, masks, ones_row):
        # f: (rows, L) -> im2col matrix (9*rows + 1, L); shifts are pure lane slices.
        # Masks zero out taps that fall outside the (chunk-)image, so the zero padding
        # and the shifted lane access are handled together.
        zp = jnp.zeros((f.shape[0], padl), f.dtype)
        fp = jnp.concatenate([zp, f, zp], axis=1)              # (rows, L + 2*padl)
        cols = []
        for k, s in enumerate(shifts):
            if s == 0:
                cols.append(f)                                 # center tap: mask is all-ones
            else:
                cols.append(masks[k:k + 1, :] * fp[:, padl + s: padl + s + L])
        cols.append(ones_row)                                  # bias row
        return jnp.concatenate(cols, axis=0)

    def chunk_select(t, cm, rows_per, base=0):
        # pick row-block i (offset `base`) of the stacked result at chunk-i lane positions
        acc = cm[0:1, :] * t[base:base + rows_per, :]
        for i in range(1, N_LOCAL):
            o = base + i * rows_per
            acc = acc + cm[i:i + 1, :] * t[o:o + rows_per, :]
        return acc

    def leaky(y):
        return jnp.maximum(y, 0.01 * y)                        # exact leaky_relu(0.01)

    def kernel(x_ref, w_red_ref, b_red_ref,
               wg_d0_ref, wg_d1_ref, wg_fin_ref,
               wl_d0_ref, wl_d1_ref, wl_fin_ref,
               mg_ref, ml_ref, cm_ref, o_ref):
        x = x_ref[...]                                         # (C, L)
        ones_row = jnp.ones((1, L), jnp.float32)
        mg = mg_ref[...]
        ml = ml_ref[...]
        cm = cm_ref[...]

        def mm(a, b):
            return jnp.dot(a, b, preferred_element_type=jnp.float32)

        # ---- fused reduce conv: global + 8 locals in ONE matmul, contraction = C ----
        t = jnp.maximum(mm(w_red_ref[...], x) + b_red_ref[...], 0.0)           # (9cr, L)
        f_g = t[0:cr, :]                                                       # global features
        f_l = chunk_select(t, cm, cr, base=cr)                                 # local features

        # ---- global SpatialGate ----
        f = jnp.maximum(mm(wg_d0_ref[...], build_fcol(f_g, mg, ones_row)), 0.0)
        f = jnp.maximum(mm(wg_d1_ref[...], build_fcol(f, mg, ones_row)), 0.0)
        att_g = mm(wg_fin_ref[...], jnp.concatenate([f, ones_row], axis=0))    # (1, L)
        gate_g = 1.0 + jax.nn.sigmoid(att_g)

        # ---- 8 local SpatialGates, weights stacked along the output-channel axis ----
        t = jnp.maximum(mm(wl_d0_ref[...], build_fcol(f_l, ml, ones_row)), 0.0)
        f = chunk_select(t, cm, cr)
        t = jnp.maximum(mm(wl_d1_ref[...], build_fcol(f, ml, ones_row)), 0.0)
        f = chunk_select(t, cm, cr)
        t = mm(wl_fin_ref[...], jnp.concatenate([f, ones_row], axis=0))        # (8, L)
        att_l = jnp.sum(cm * t, axis=0, keepdims=True)                         # (1, L)
        gate_l = 1.0 + jax.nn.sigmoid(att_l)

        # ---- apply gates + fused leaky_relu; two full-width (C, L) stores ----
        o_ref[0] = leaky(x * gate_g)
        o_ref[1] = leaky(x * gate_l)

    return kernel


# ----------------------------------------------------------------------------- wrapper
def gl_spatial_gate(x, params):
    """x: (n, C, H, W) float32 -> (n, C, 2H, W), eval-mode GLSpatialGate forward."""
    n, C, H, W = x.shape
    assert C % 16 == 0, "gate_channel must be divisible by reduction_ratio=16"
    assert H % N_LOCAL == 0, "H must be divisible by 2**halving = 8"
    cr = C // 16
    Hc = H // N_LOCAL
    hw = H * W
    nb = choose_nb(n, hw)
    G = n // nb
    L = nb * hw

    # ---- pack parameters (BN folded) ----
    g = pack_gate(params["global"])
    lp = [pack_gate(p) for p in params["local"]]
    # reduce conv: global + 8 locals stacked into one weight / bias
    w_red = jnp.concatenate([g[0][0]] + [q[0][0] for q in lp], axis=0)            # (9cr, C)
    b_red = jnp.concatenate([g[0][1]] + [q[0][1] for q in lp], axis=0)[:, None]   # (9cr, 1)
    g_d0, g_d1, g_fin = g[1], g[2], g[3]
    wl_d0 = jnp.concatenate([q[1] for q in lp], axis=0)    # (8cr, 9cr+1)
    wl_d1 = jnp.concatenate([q[2] for q in lp], axis=0)    # (8cr, 9cr+1)
    wl_fin = jnp.concatenate([q[3] for q in lp], axis=0)   # (8,   cr+1)

    mg, ml, cm, shifts = build_masks(H, W, Hc, nb)

    # lane-dense slab: (G, C, nb*H*W), lane index = b_in*H*W + h*W + w
    x_slab = x.reshape(G, nb, C, hw).transpose(0, 2, 1, 3).reshape(G, C, L)

    kernel = make_kernel(cr, L, shifts)
    const = lambda shape: pl.BlockSpec(shape, lambda i: tuple(0 for _ in shape))

    out = pl.pallas_call(
        kernel,
        out_shape=jax.ShapeDtypeStruct((G, 2, C, L), jnp.float32),
        grid_spec=pltpu.PrefetchScalarGridSpec(
            num_scalar_prefetch=0,
            grid=(G,),
            in_specs=[
                pl.BlockSpec((None, C, L), lambda i: (i, 0, 0)),
                const((N_LOCAL * cr + cr, C)),
                const((N_LOCAL * cr + cr, 1)),
                const((cr, 9 * cr + 1)),
                const((cr, 9 * cr + 1)),
                const((1, cr + 1)),
                const((N_LOCAL * cr, 9 * cr + 1)),
                const((N_LOCAL * cr, 9 * cr + 1)),
                const((N_LOCAL, cr + 1)),
                const((9, L)),
                const((9, L)),
                const((N_LOCAL, L)),
            ],
            out_specs=pl.BlockSpec((None, 2, C, L), lambda i: (i, 0, 0, 0)),
        ),
        # NOTE: for production shapes (large C / H*W) raise vmem_limit_bytes here;
        # at these sizes the default scoped VMEM limit is ample on v5e/v6e/v7x.
        compiler_params=pltpu.CompilerParams(dimension_semantics=("parallel",)),
    )(x_slab, w_red, b_red, g_d0, g_d1, g_fin, wl_d0, wl_d1, wl_fin, mg, ml, cm)

    # (G, 2, C, L) -> (n, C, 2H, W) : global half = rows [0,H), local half = rows [H,2H)
    out = out.reshape(G, 2, C, nb, hw).transpose(0, 3, 2, 1, 4).reshape(n, C, 2 * H, W)
    return out


# ----------------------------------------------------------------------------- reference
def spatial_gate_ref(x, p, eps=1e-5):
    def conv(z, w, b, dilation=1, padding=0):
        y = lax.conv_general_dilated(
            z, w, (1, 1), [(padding, padding), (padding, padding)],
            rhs_dilation=(dilation, dilation),
            dimension_numbers=("NCHW", "OIHW", "NCHW"),
            precision=lax.Precision.HIGHEST)
        return y + b[None, :, None, None]

    def bn(z, gamma, beta, mean, var):
        return (z - mean[None, :, None, None]) / jnp.sqrt(var[None, :, None, None] + eps) \
            * gamma[None, :, None, None] + beta[None, :, None, None]

    y = jax.nn.relu(bn(conv(x, p["w_red"], p["b_red"]), *p["bn_red"]))
    y = jax.nn.relu(bn(conv(y, p["w_d0"], p["b_d0"], dilation=DIL, padding=DIL), *p["bn_d0"]))
    y = jax.nn.relu(bn(conv(y, p["w_d1"], p["b_d1"], dilation=DIL, padding=DIL), *p["bn_d1"]))
    att = 1.0 + jax.nn.sigmoid(conv(y, p["w_fin"], p["b_fin"]))
    return x * att


def gl_spatial_gate_ref(x, params):
    gob = spatial_gate_ref(x, params["global"])
    Hc = x.shape[2] // N_LOCAL
    lcl = jnp.concatenate(
        [spatial_gate_ref(x[:, :, i * Hc:(i + 1) * Hc, :], params["local"][i])
         for i in range(N_LOCAL)], axis=2)
    return jax.nn.leaky_relu(jnp.concatenate([gob, lcl], axis=2), negative_slope=0.01)


# ----------------------------------------------------------------------------- main
if __name__ == "__main__":
    key = jax.random.PRNGKey(0)
    k_x, k_p = jax.random.split(key)

    # small shapes: batch=2, gate_channel=32 (cr=2), H=16 (8 chunks of 2), W=8 (H*W=128 lanes)
    n, C, H, W = 2, 32, 16, 8
    x = jax.random.normal(k_x, (n, C, H, W), jnp.float32)

    gate_keys = jax.random.split(k_p, 1 + N_LOCAL)
    params = {
        "global": init_spatial_gate_params(gate_keys[0], C),
        "local": [init_spatial_gate_params(gate_keys[1 + i], C) for i in range(N_LOCAL)],
    }

    out = gl_spatial_gate(x, params)
    out = jax.block_until_ready(out)
    assert out.shape == (n, C, 2 * H, W)

    ref = gl_spatial_gate_ref(x, params)
    np.testing.assert_allclose(np.asarray(out), np.asarray(ref), rtol=1e-2, atol=1e-2)
    print("KERNEL_OK")
</pallas_src>

<mosaic_0001>
module attributes {stable_mosaic.version = 11 : i64} {
  func.func @kernel(%arg0: i32, %arg1: memref<1x32x128xf32, #tpu.memory_space<vmem>>, %arg2: memref<18x32xf32, #tpu.memory_space<vmem>>, %arg3: memref<18x1xf32, #tpu.memory_space<vmem>>, %arg4: memref<2x19xf32, #tpu.memory_space<vmem>>, %arg5: memref<2x19xf32, #tpu.memory_space<vmem>>, %arg6: memref<1x3xf32, #tpu.memory_space<vmem>>, %arg7: memref<16x19xf32, #tpu.memory_space<vmem>>, %arg8: memref<16x19xf32, #tpu.memory_space<vmem>>, %arg9: memref<8x3xf32, #tpu.memory_space<vmem>>, %arg10: memref<9x128xf32, #tpu.memory_space<vmem>>, %arg11: memref<9x128xf32, #tpu.memory_space<vmem>>, %arg12: memref<8x128xf32, #tpu.memory_space<vmem>>, %arg13: memref<1x2x32x128xf32, #tpu.memory_space<vmem>>) attributes {dimension_semantics = [#tpu.dimension_semantics<parallel>], iteration_bounds = array<i64: 2>, scalar_prefetch = 0 : i64, scratch_operands = 0 : i64, tpu.core_type = #tpu.core_type<tc>, window_params = [{transform_indices = @transform_0, window_bounds = array<i64: 1, 32, 128>}, {pipeline_mode = #tpu.pipeline_mode<synchronous>, transform_indices = @transform_1, window_bounds = array<i64: 18, 32>}, {pipeline_mode = #tpu.pipeline_mode<synchronous>, transform_indices = @transform_2, window_bounds = array<i64: 18, 1>}, {pipeline_mode = #tpu.pipeline_mode<synchronous>, transform_indices = @transform_3, window_bounds = array<i64: 2, 19>}, {pipeline_mode = #tpu.pipeline_mode<synchronous>, transform_indices = @transform_4, window_bounds = array<i64: 2, 19>}, {pipeline_mode = #tpu.pipeline_mode<synchronous>, transform_indices = @transform_5, window_bounds = array<i64: 1, 3>}, {pipeline_mode = #tpu.pipeline_mode<synchronous>, transform_indices = @transform_6, window_bounds = array<i64: 16, 19>}, {pipeline_mode = #tpu.pipeline_mode<synchronous>, transform_indices = @transform_7, window_bounds = array<i64: 16, 19>}, {pipeline_mode = #tpu.pipeline_mode<synchronous>, transform_indices = @transform_8, window_bounds = array<i64: 8, 3>}, {pipeline_mode = #tpu.pipeline_mode<synchronous>, transform_indices = @transform_9, window_bounds = array<i64: 9, 128>}, {pipeline_mode = #tpu.pipeline_mode<synchronous>, transform_indices = @transform_10, window_bounds = array<i64: 9, 128>}, {pipeline_mode = #tpu.pipeline_mode<synchronous>, transform_indices = @transform_11, window_bounds = array<i64: 8, 128>}, {transform_indices = @transform_12, window_bounds = array<i64: 1, 2, 32, 128>}]} {
    %c0 = arith.constant 0 : index
    %c0_0 = arith.constant 0 : index
    %c0_1 = arith.constant 0 : index
    %0 = vector.load %arg1[%c0, %c0_0, %c0_1] : memref<1x32x128xf32, #tpu.memory_space<vmem>>, vector<1x32x128xf32>
    %1 = vector.shape_cast %0 : vector<1x32x128xf32> to vector<32x128xf32>
    %cst = arith.constant 1.000000e+00 : f32
    %2 = vector.broadcast %cst : f32 to vector<1x128xf32>
    %c0_2 = arith.constant 0 : index
    %c0_3 = arith.constant 0 : index
    %3 = vector.load %arg10[%c0_2, %c0_3] : memref<9x128xf32, #tpu.memory_space<vmem>>, vector<9x128xf32>
    %c0_4 = arith.constant 0 : index
    %c0_5 = arith.constant 0 : index
    %4 = vector.load %arg11[%c0_4, %c0_5] : memref<9x128xf32, #tpu.memory_space<vmem>>, vector<9x128xf32>
    %c0_6 = arith.constant 0 : index
    %c0_7 = arith.constant 0 : index
    %5 = vector.load %arg12[%c0_6, %c0_7] : memref<8x128xf32, #tpu.memory_space<vmem>>, vector<8x128xf32>
    %c0_8 = arith.constant 0 : index
    %c0_9 = arith.constant 0 : index
    %6 = vector.load %arg2[%c0_8, %c0_9] : memref<18x32xf32, #tpu.memory_space<vmem>>, vector<18x32xf32>
    %cst_10 = arith.constant dense<0.000000e+00> : vector<18x128xf32>
    %7 = tpu.matmul %6, %1, %cst_10 {dimension_numbers = #tpu.dot_dimension_numbers<[1], [0], [0], [1], [0, 0, 1, 1], [], []>} : vector<18x32xf32>, vector<32x128xf32>, vector<18x128xf32> -> vector<18x128xf32>
    %c0_11 = arith.constant 0 : index
    %c0_12 = arith.constant 0 : index
    %8 = vector.load %arg3[%c0_11, %c0_12] : memref<18x1xf32, #tpu.memory_space<vmem>>, vector<18x1xf32>
    %9 = vector.broadcast %8 : vector<18x1xf32> to vector<18x128xf32>
    %10 = arith.addf %7, %9 : vector<18x128xf32>
    %cst_13 = arith.constant 0.000000e+00 : f32
    %11 = vector.broadcast %cst_13 : f32 to vector<18x128xf32>
    %12 = arith.maximumf %10, %11 : vector<18x128xf32>
    %13 = vector.extract_strided_slice %12 {offsets = [0, 0], sizes = [2, 128], strides = [1, 1]} : vector<18x128xf32> to vector<2x128xf32>
    %14 = vector.extract_strided_slice %5 {offsets = [0, 0], sizes = [1, 128], strides = [1, 1]} : vector<8x128xf32> to vector<1x128xf32>
    %15 = vector.extract_strided_slice %12 {offsets = [2, 0], sizes = [2, 128], strides = [1, 1]} : vector<18x128xf32> to vector<2x128xf32>
    %16 = vector.broadcast %14 : vector<1x128xf32> to vector<2x128xf32>
    %17 = arith.mulf %16, %15 : vector<2x128xf32>
    %18 = vector.extract_strided_slice %5 {offsets = [1, 0], sizes = [1, 128], strides = [1, 1]} : vector<8x128xf32> to vector<1x128xf32>
    %19 = vector.extract_strided_slice %12 {offsets = [4, 0], sizes = [2, 128], strides = [1, 1]} : vector<18x128xf32> to vector<2x128xf32>
    %20 = vector.broadcast %18 : vector<1x128xf32> to vector<2x128xf32>
    %21 = arith.mulf %20, %19 : vector<2x128xf32>
    %22 = arith.addf %17, %21 : vector<2x128xf32>
    %23 = vector.extract_strided_slice %5 {offsets = [2, 0], sizes = [1, 128], strides = [1, 1]} : vector<8x128xf32> to vector<1x128xf32>
    %24 = vector.extract_strided_slice %12 {offsets = [6, 0], sizes = [2, 128], strides = [1, 1]} : vector<18x128xf32> to vector<2x128xf32>
    %25 = vector.broadcast %23 : vector<1x128xf32> to vector<2x128xf32>
    %26 = arith.mulf %25, %24 : vector<2x128xf32>
    %27 = arith.addf %22, %26 : vector<2x128xf32>
    %28 = vector.extract_strided_slice %5 {offsets = [3, 0], sizes = [1, 128], strides = [1, 1]} : vector<8x128xf32> to vector<1x128xf32>
    %29 = vector.extract_strided_slice %12 {offsets = [8, 0], sizes = [2, 128], strides = [1, 1]} : vector<18x128xf32> to vector<2x128xf32>
    %30 = vector.broadcast %28 : vector<1x128xf32> to vector<2x128xf32>
    %31 = arith.mulf %30, %29 : vector<2x128xf32>
    %32 = arith.addf %27, %31 : vector<2x128xf32>
    %33 = vector.extract_strided_slice %5 {offsets = [4, 0], sizes = [1, 128], strides = [1, 1]} : vector<8x128xf32> to vector<1x128xf32>
    %34 = vector.extract_strided_slice %12 {offsets = [10, 0], sizes = [2, 128], strides = [1, 1]} : vector<18x128xf32> to vector<2x128xf32>
    %35 = vector.broadcast %33 : vector<1x128xf32> to vector<2x128xf32>
    %36 = arith.mulf %35, %34 : vector<2x128xf32>
    %37 = arith.addf %32, %36 : vector<2x128xf32>
    %38 = vector.extract_strided_slice %5 {offsets = [5, 0], sizes = [1, 128], strides = [1, 1]} : vector<8x128xf32> to vector<1x128xf32>
    %39 = vector.extract_strided_slice %12 {offsets = [12, 0], sizes = [2, 128], strides = [1, 1]} : vector<18x128xf32> to vector<2x128xf32>
    %40 = vector.broadcast %38 : vector<1x128xf32> to vector<2x128xf32>
    %41 = arith.mulf %40, %39 : vector<2x128xf32>
    %42 = arith.addf %37, %41 : vector<2x128xf32>
    %43 = vector.extract_strided_slice %5 {offsets = [6, 0], sizes = [1, 128], strides = [1, 1]} : vector<8x128xf32> to vector<1x128xf32>
    %44 = vector.extract_strided_slice %12 {offsets = [14, 0], sizes = [2, 128], strides = [1, 1]} : vector<18x128xf32> to vector<2x128xf32>
    %45 = vector.broadcast %43 : vector<1x128xf32> to vector<2x128xf32>
    %46 = arith.mulf %45, %44 : vector<2x128xf32>
    %47 = arith.addf %42, %46 : vector<2x128xf32>
    %48 = vector.extract_strided_slice %5 {offsets = [7, 0], sizes = [1, 128], strides = [1, 1]} : vector<8x128xf32> to vector<1x128xf32>
    %49 = vector.extract_strided_slice %12 {offsets = [16, 0], sizes = [2, 128], strides = [1, 1]} : vector<18x128xf32> to vector<2x128xf32>
    %50 = vector.broadcast %48 : vector<1x128xf32> to vector<2x128xf32>
    %51 = arith.mulf %50, %49 : vector<2x128xf32>
    %52 = arith.addf %47, %51 : vector<2x128xf32>
    %c0_14 = arith.constant 0 : index
    %c0_15 = arith.constant 0 : index
    %53 = vector.load %arg4[%c0_14, %c0_15] : memref<2x19xf32, #tpu.memory_space<vmem>>, vector<2x19xf32>
    %cst_16 = arith.constant 0.000000e+00 : f32
    %54 = vector.broadcast %cst_16 : f32 to vector<2x36xf32>
    %55 = tpu.concatenate %54, %13, %54 in 1 : vector<2x36xf32>, vector<2x128xf32>, vector<2x36xf32> -> vector<2x200xf32>
    %56 = vector.extract_strided_slice %3 {offsets = [0, 0], sizes = [1, 128], strides = [1, 1]} : vector<9x128xf32> to vector<1x128xf32>
    %57 = vector.extract_strided_slice %55 {offsets = [0, 0], sizes = [2, 128], strides = [1, 1]} : vector<2x200xf32> to vector<2x128xf32>
    %58 = vector.broadcast %56 : vector<1x128xf32> to vector<2x128xf32>
    %59 = arith.mulf %58, %57 : vector<2x128xf32>
    %60 = vector.extract_strided_slice %3 {offsets = [1, 0], sizes = [1, 128], strides = [1, 1]} : vector<9x128xf32> to vector<1x128xf32>
    %61 = vector.extract_strided_slice %55 {offsets = [0, 4], sizes = [2, 128], strides = [1, 1]} : vector<2x200xf32> to vector<2x128xf32>
    %62 = vector.broadcast %60 : vector<1x128xf32> to vector<2x128xf32>
    %63 = arith.mulf %62, %61 : vector<2x128xf32>
    %64 = vector.extract_strided_slice %3 {offsets = [2, 0], sizes = [1, 128], strides = [1, 1]} : vector<9x128xf32> to vector<1x128xf32>
    %65 = vector.extract_strided_slice %55 {offsets = [0, 8], sizes = [2, 128], strides = [1, 1]} : vector<2x200xf32> to vector<2x128xf32>
    %66 = vector.broadcast %64 : vector<1x128xf32> to vector<2x128xf32>
    %67 = arith.mulf %66, %65 : vector<2x128xf32>
    %68 = vector.extract_strided_slice %3 {offsets = [3, 0], sizes = [1, 128], strides = [1, 1]} : vector<9x128xf32> to vector<1x128xf32>
    %69 = vector.extract_strided_slice %55 {offsets = [0, 32], sizes = [2, 128], strides = [1, 1]} : vector<2x200xf32> to vector<2x128xf32>
    %70 = vector.broadcast %68 : vector<1x128xf32> to vector<2x128xf32>
    %71 = arith.mulf %70, %69 : vector<2x128xf32>
    %72 = vector.extract_strided_slice %3 {offsets = [5, 0], sizes = [1, 128], strides = [1, 1]} : vector<9x128xf32> to vector<1x128xf32>
    %73 = vector.extract_strided_slice %55 {offsets = [0, 40], sizes = [2, 128], strides = [1, 1]} : vector<2x200xf32> to vector<2x128xf32>
    %74 = vector.broadcast %72 : vector<1x128xf32> to vector<2x128xf32>
    %75 = arith.mulf %74, %73 : vector<2x128xf32>
    %76 = vector.extract_strided_slice %3 {offsets = [6, 0], sizes = [1, 128], strides = [1, 1]} : vector<9x128xf32> to vector<1x128xf32>
    %77 = vector.extract_strided_slice %55 {offsets = [0, 64], sizes = [2, 128], strides = [1, 1]} : vector<2x200xf32> to vector<2x128xf32>
    %78 = vector.broadcast %76 : vector<1x128xf32> to vector<2x128xf32>
    %79 = arith.mulf %78, %77 : vector<2x128xf32>
    %80 = vector.extract_strided_slice %3 {offsets = [7, 0], sizes = [1, 128], strides = [1, 1]} : vector<9x128xf32> to vector<1x128xf32>
    %81 = vector.extract_strided_slice %55 {offsets = [0, 68], sizes = [2, 128], strides = [1, 1]} : vector<2x200xf32> to vector<2x128xf32>
    %82 = vector.broadcast %80 : vector<1x128xf32> to vector<2x128xf32>
    %83 = arith.mulf %82, %81 : vector<2x128xf32>
    %84 = vector.extract_strided_slice %3 {offsets = [8, 0], sizes = [1, 128], strides = [1, 1]} : vector<9x128xf32> to vector<1x128xf32>
    %85 = vector.extract_strided_slice %55 {offsets = [0, 72], sizes = [2, 128], strides = [1, 1]} : vector<2x200xf32> to vector<2x128xf32>
    %86 = vector.broadcast %84 : vector<1x128xf32> to vector<2x128xf32>
    %87 = arith.mulf %86, %85 : vector<2x128xf32>
    %88 = tpu.concatenate %59, %63, %67, %71, %13, %75, %79, %83, %87, %2 in 0 : vector<2x128xf32>, vector<2x128xf32>, vector<2x128xf32>, vector<2x128xf32>, vector<2x128xf32>, vector<2x128xf32>, vector<2x128xf32>, vector<2x128xf32>, vector<2x128xf32>, vector<1x128xf32> -> vector<19x128xf32>
    %cst_17 = arith.constant dense<0.000000e+00> : vector<2x128xf32>
    %89 = tpu.matmul %53, %88, %cst_17 {dimension_numbers = #tpu.dot_dimension_numbers<[1], [0], [0], [1], [0, 0, 1, 1], [], []>} : vector<2x19xf32>, vector<19x128xf32>, vector<2x128xf32> -> vector<2x128xf32>
    %cst_18 = arith.constant 0.000000e+00 : f32
    %90 = vector.broadcast %cst_18 : f32 to vector<2x128xf32>
    %91 = arith.maximumf %89, %90 : vector<2x128xf32>
    %c0_19 = arith.constant 0 : index
    %c0_20 = arith.constant 0 : index
    %92 = vector.load %arg5[%c0_19, %c0_20] : memref<2x19xf32, #tpu.memory_space<vmem>>, vector<2x19xf32>
    %cst_21 = arith.constant 0.000000e+00 : f32
    %93 = vector.broadcast %cst_21 : f32 to vector<2x36xf32>
    %94 = tpu.concatenate %93, %91, %93 in 1 : vector<2x36xf32>, vector<2x128xf32>, vector<2x36xf32> -> vector<2x200xf32>
    %95 = vector.extract_strided_slice %3 {offsets = [0, 0], sizes = [1, 128], strides = [1, 1]} : vector<9x128xf32> to vector<1x128xf32>
    %96 = vector.extract_strided_slice %94 {offsets = [0, 0], sizes = [2, 128], strides = [1, 1]} : vector<2x200xf32> to vector<2x128xf32>
    %97 = vector.broadcast %95 : vector<1x128xf32> to vector<2x128xf32>
    %98 = arith.mulf %97, %96 : vector<2x128xf32>
    %99 = vector.extract_strided_slice %3 {offsets = [1, 0], sizes = [1, 128], strides = [1, 1]} : vector<9x128xf32> to vector<1x128xf32>
    %100 = vector.extract_strided_slice %94 {offsets = [0, 4], sizes = [2, 128], strides = [1, 1]} : vector<2x200xf32> to vector<2x128xf32>
    %101 = vector.broadcast %99 : vector<1x128xf32> to vector<2x128xf32>
    %102 = arith.mulf %101, %100 : vector<2x128xf32>
    %103 = vector.extract_strided_slice %3 {offsets = [2, 0], sizes = [1, 128], strides = [1, 1]} : vector<9x128xf32> to vector<1x128xf32>
    %104 = vector.extract_strided_slice %94 {offsets = [0, 8], sizes = [2, 128], strides = [1, 1]} : vector<2x200xf32> to vector<2x128xf32>
    %105 = vector.broadcast %103 : vector<1x128xf32> to vector<2x128xf32>
    %106 = arith.mulf %105, %104 : vector<2x128xf32>
    %107 = vector.extract_strided_slice %3 {offsets = [3, 0], sizes = [1, 128], strides = [1, 1]} : vector<9x128xf32> to vector<1x128xf32>
    %108 = vector.extract_strided_slice %94 {offsets = [0, 32], sizes = [2, 128], strides = [1, 1]} : vector<2x200xf32> to vector<2x128xf32>
    %109 = vector.broadcast %107 : vector<1x128xf32> to vector<2x128xf32>
    %110 = arith.mulf %109, %108 : vector<2x128xf32>
    %111 = vector.extract_strided_slice %3 {offsets = [5, 0], sizes = [1, 128], strides = [1, 1]} : vector<9x128xf32> to vector<1x128xf32>
    %112 = vector.extract_strided_slice %94 {offsets = [0, 40], sizes = [2, 128], strides = [1, 1]} : vector<2x200xf32> to vector<2x128xf32>
    %113 = vector.broadcast %111 : vector<1x128xf32> to vector<2x128xf32>
    %114 = arith.mulf %113, %112 : vector<2x128xf32>
    %115 = vector.extract_strided_slice %3 {offsets = [6, 0], sizes = [1, 128], strides = [1, 1]} : vector<9x128xf32> to vector<1x128xf32>
    %116 = vector.extract_strided_slice %94 {offsets = [0, 64], sizes = [2, 128], strides = [1, 1]} : vector<2x200xf32> to vector<2x128xf32>
    %117 = vector.broadcast %115 : vector<1x128xf32> to vector<2x128xf32>
    %118 = arith.mulf %117, %116 : vector<2x128xf32>
    %119 = vector.extract_strided_slice %3 {offsets = [7, 0], sizes = [1, 128], strides = [1, 1]} : vector<9x128xf32> to vector<1x128xf32>
    %120 = vector.extract_strided_slice %94 {offsets = [0, 68], sizes = [2, 128], strides = [1, 1]} : vector<2x200xf32> to vector<2x128xf32>
    %121 = vector.broadcast %119 : vector<1x128xf32> to vector<2x128xf32>
    %122 = arith.mulf %121, %120 : vector<2x128xf32>
    %123 = vector.extract_strided_slice %3 {offsets = [8, 0], sizes = [1, 128], strides = [1, 1]} : vector<9x128xf32> to vector<1x128xf32>
    %124 = vector.extract_strided_slice %94 {offsets = [0, 72], sizes = [2, 128], strides = [1, 1]} : vector<2x200xf32> to vector<2x128xf32>
    %125 = vector.broadcast %123 : vector<1x128xf32> to vector<2x128xf32>
    %126 = arith.mulf %125, %124 : vector<2x128xf32>
    %127 = tpu.concatenate %98, %102, %106, %110, %91, %114, %118, %122, %126, %2 in 0 : vector<2x128xf32>, vector<2x128xf32>, vector<2x128xf32>, vector<2x128xf32>, vector<2x128xf32>, vector<2x128xf32>, vector<2x128xf32>, vector<2x128xf32>, vector<2x128xf32>, vector<1x128xf32> -> vector<19x128xf32>
    %cst_22 = arith.constant dense<0.000000e+00> : vector<2x128xf32>
    %128 = tpu.matmul %92, %127, %cst_22 {dimension_numbers = #tpu.dot_dimension_numbers<[1], [0], [0], [1], [0, 0, 1, 1], [], []>} : vector<2x19xf32>, vector<19x128xf32>, vector<2x128xf32> -> vector<2x128xf32>
    %cst_23 = arith.constant 0.000000e+00 : f32
    %129 = vector.broadcast %cst_23 : f32 to vector<2x128xf32>
    %130 = arith.maximumf %128, %129 : vector<2x128xf32>
    %c0_24 = arith.constant 0 : index
    %c0_25 = arith.constant 0 : index
    %131 = vector.load %arg6[%c0_24, %c0_25] : memref<1x3xf32, #tpu.memory_space<vmem>>, vector<1x3xf32>
    %132 = tpu.concatenate %130, %2 in 0 : vector<2x128xf32>, vector<1x128xf32> -> vector<3x128xf32>
    %cst_26 = arith.constant dense<0.000000e+00> : vector<1x128xf32>
    %133 = tpu.matmul %131, %132, %cst_26 {dimension_numbers = #tpu.dot_dimension_numbers<[1], [0], [0], [1], [0, 0, 1, 1], [], []>} : vector<1x3xf32>, vector<3x128xf32>, vector<1x128xf32> -> vector<1x128xf32>
    %134 = arith.negf %133 : vector<1x128xf32>
    %135 = math.exp %134 : vector<1x128xf32>
    %cst_27 = arith.constant 1.000000e+00 : f32
    %136 = vector.broadcast %cst_27 : f32 to vector<1x128xf32>
    %137 = arith.addf %136, %135 : vector<1x128xf32>
    %138 = arith.divf %136, %137 : vector<1x128xf32>
    %cst_28 = arith.constant 1.000000e+00 : f32
    %139 = vector.broadcast %cst_28 : f32 to vector<1x128xf32>
    %140 = arith.addf %139, %138 : vector<1x128xf32>
    %c0_29 = arith.constant 0 : index
    %c0_30 = arith.constant 0 : index
    %141 = vector.load %arg7[%c0_29, %c0_30] : memref<16x19xf32, #tpu.memory_space<vmem>>, vector<16x19xf32>
    %cst_31 = arith.constant 0.000000e+00 : f32
    %142 = vector.broadcast %cst_31 : f32 to vector<2x36xf32>
    %143 = tpu.concatenate %142, %52, %142 in 1 : vector<2x36xf32>, vector<2x128xf32>, vector<2x36xf32> -> vector<2x200xf32>
    %144 = vector.extract_strided_slice %4 {offsets = [0, 0], sizes = [1, 128], strides = [1, 1]} : vector<9x128xf32> to vector<1x128xf32>
    %145 = vector.extract_strided_slice %143 {offsets = [0, 0], sizes = [2, 128], strides = [1, 1]} : vector<2x200xf32> to vector<2x128xf32>
    %146 = vector.broadcast %144 : vector<1x128xf32> to vector<2x128xf32>
    %147 = arith.mulf %146, %145 : vector<2x128xf32>
    %148 = vector.extract_strided_slice %4 {offsets = [1, 0], sizes = [1, 128], strides = [1, 1]} : vector<9x128xf32> to vector<1x128xf32>
    %149 = vector.extract_strided_slice %143 {offsets = [0, 4], sizes = [2, 128], strides = [1, 1]} : vector<2x200xf32> to vector<2x128xf32>
    %150 = vector.broadcast %148 : vector<1x128xf32> to vector<2x128xf32>
    %151 = arith.mulf %150, %149 : vector<2x128xf32>
    %152 = vector.extract_strided_slice %4 {offsets = [2, 0], sizes = [1, 128], strides = [1, 1]} : vector<9x128xf32> to vector<1x128xf32>
    %153 = vector.extract_strided_slice %143 {offsets = [0, 8], sizes = [2, 128], strides = [1, 1]} : vector<2x200xf32> to vector<2x128xf32>
    %154 = vector.broadcast %152 : vector<1x128xf32> to vector<2x128xf32>
    %155 = arith.mulf %154, %153 : vector<2x128xf32>
    %156 = vector.extract_strided_slice %4 {offsets = [3, 0], sizes = [1, 128], strides = [1, 1]} : vector<9x128xf32> to vector<1x128xf32>
    %157 = vector.extract_strided_slice %143 {offsets = [0, 32], sizes = [2, 128], strides = [1, 1]} : vector<2x200xf32> to vector<2x128xf32>
    %158 = vector.broadcast %156 : vector<1x128xf32> to vector<2x128xf32>
    %159 = arith.mulf %158, %157 : vector<2x128xf32>
    %160 = vector.extract_strided_slice %4 {offsets = [5, 0], sizes = [1, 128], strides = [1, 1]} : vector<9x128xf32> to vector<1x128xf32>
    %161 = vector.extract_strided_slice %143 {offsets = [0, 40], sizes = [2, 128], strides = [1, 1]} : vector<2x200xf32> to vector<2x128xf32>
    %162 = vector.broadcast %160 : vector<1x128xf32> to vector<2x128xf32>
    %163 = arith.mulf %162, %161 : vector<2x128xf32>
    %164 = vector.extract_strided_slice %4 {offsets = [6, 0], sizes = [1, 128], strides = [1, 1]} : vector<9x128xf32> to vector<1x128xf32>
    %165 = vector.extract_strided_slice %143 {offsets = [0, 64], sizes = [2, 128], strides = [1, 1]} : vector<2x200xf32> to vector<2x128xf32>
    %166 = vector.broadcast %164 : vector<1x128xf32> to vector<2x128xf32>
    %167 = arith.mulf %166, %165 : vector<2x128xf32>
    %168 = vector.extract_strided_slice %4 {offsets = [7, 0], sizes = [1, 128], strides = [1, 1]} : vector<9x128xf32> to vector<1x128xf32>
    %169 = vector.extract_strided_slice %143 {offsets = [0, 68], sizes = [2, 128], strides = [1, 1]} : vector<2x200xf32> to vector<2x128xf32>
    %170 = vector.broadcast %168 : vector<1x128xf32> to vector<2x128xf32>
    %171 = arith.mulf %170, %169 : vector<2x128xf32>
    %172 = vector.extract_strided_slice %4 {offsets = [8, 0], sizes = [1, 128], strides = [1, 1]} : vector<9x128xf32> to vector<1x128xf32>
    %173 = vector.extract_strided_slice %143 {offsets = [0, 72], sizes = [2, 128], strides = [1, 1]} : vector<2x200xf32> to vector<2x128xf32>
    %174 = vector.broadcast %172 : vector<1x128xf32> to vector<2x128xf32>
    %175 = arith.mulf %174, %173 : vector<2x128xf32>
    %176 = tpu.concatenate %147, %151, %155, %159, %52, %163, %167, %171, %175, %2 in 0 : vector<2x128xf32>, vector<2x128xf32>, vector<2x128xf32>, vector<2x128xf32>, vector<2x128xf32>, vector<2x128xf32>, vector<2x128xf32>, vector<2x128xf32>, vector<2x128xf32>, vector<1x128xf32> -> vector<19x128xf32>
    %cst_32 = arith.constant dense<0.000000e+00> : vector<16x128xf32>
    %177 = tpu.matmul %141, %176, %cst_32 {dimension_numbers = #tpu.dot_dimension_numbers<[1], [0], [0], [1], [0, 0, 1, 1], [], []>} : vector<16x19xf32>, vector<19x128xf32>, vector<16x128xf32> -> vector<16x128xf32>
    %cst_33 = arith.constant 0.000000e+00 : f32
    %178 = vector.broadcast %cst_33 : f32 to vector<16x128xf32>
    %179 = arith.maximumf %177, %178 : vector<16x128xf32>
    %180 = vector.extract_strided_slice %5 {offsets = [0, 0], sizes = [1, 128], strides = [1, 1]} : vector<8x128xf32> to vector<1x128xf32>
    %181 = vector.extract_strided_slice %179 {offsets = [0, 0], sizes = [2, 128], strides = [1, 1]} : vector<16x128xf32> to vector<2x128xf32>
    %182 = vector.broadcast %180 : vector<1x128xf32> to vector<2x128xf32>
    %183 = arith.mulf %182, %181 : vector<2x128xf32>
    %184 = vector.extract_strided_slice %5 {offsets = [1, 0], sizes = [1, 128], strides = [1, 1]} : vector<8x128xf32> to vector<1x128xf32>
    %185 = vector.extract_strided_slice %179 {offsets = [2, 0], sizes = [2, 128], strides = [1, 1]} : vector<16x128xf32> to vector<2x128xf32>
    %186 = vector.broadcast %184 : vector<1x128xf32> to vector<2x128xf32>
    %187 = arith.mulf %186, %185 : vector<2x128xf32>
    %188 = arith.addf %183, %187 : vector<2x128xf32>
    %189 = vector.extract_strided_slice %5 {offsets = [2, 0], sizes = [1, 128], strides = [1, 1]} : vector<8x128xf32> to vector<1x128xf32>
    %190 = vector.extract_strided_slice %179 {offsets = [4, 0], sizes = [2, 128], strides = [1, 1]} : vector<16x128xf32> to vector<2x128xf32>
    %191 = vector.broadcast %189 : vector<1x128xf32> to vector<2x128xf32>
    %192 = arith.mulf %191, %190 : vector<2x128xf32>
    %193 = arith.addf %188, %192 : vector<2x128xf32>
    %194 = vector.extract_strided_slice %5 {offsets = [3, 0], sizes = [1, 128], strides = [1, 1]} : vector<8x128xf32> to vector<1x128xf32>
    %195 = vector.extract_strided_slice %179 {offsets = [6, 0], sizes = [2, 128], strides = [1, 1]} : vector<16x128xf32> to vector<2x128xf32>
    %196 = vector.broadcast %194 : vector<1x128xf32> to vector<2x128xf32>
    %197 = arith.mulf %196, %195 : vector<2x128xf32>
    %198 = arith.addf %193, %197 : vector<2x128xf32>
    %199 = vector.extract_strided_slice %5 {offsets = [4, 0], sizes = [1, 128], strides = [1, 1]} : vector<8x128xf32> to vector<1x128xf32>
    %200 = vector.extract_strided_slice %179 {offsets = [8, 0], sizes = [2, 128], strides = [1, 1]} : vector<16x128xf32> to vector<2x128xf32>
    %201 = vector.broadcast %199 : vector<1x128xf32> to vector<2x128xf32>
    %202 = arith.mulf %201, %200 : vector<2x128xf32>
    %203 = arith.addf %198, %202 : vector<2x128xf32>
    %204 = vector.extract_strided_slice %5 {offsets = [5, 0], sizes = [1, 128], strides = [1, 1]} : vector<8x128xf32> to vector<1x128xf32>
    %205 = vector.extract_strided_slice %179 {offsets = [10, 0], sizes = [2, 128], strides = [1, 1]} : vector<16x128xf32> to vector<2x128xf32>
    %206 = vector.broadcast %204 : vector<1x128xf32> to vector<2x128xf32>
    %207 = arith.mulf %206, %205 : vector<2x128xf32>
    %208 = arith.addf %203, %207 : vector<2x128xf32>
    %209 = vector.extract_strided_slice %5 {offsets = [6, 0], sizes = [1, 128], strides = [1, 1]} : vector<8x128xf32> to vector<1x128xf32>
    %210 = vector.extract_strided_slice %179 {offsets = [12, 0], sizes = [2, 128], strides = [1, 1]} : vector<16x128xf32> to vector<2x128xf32>
    %211 = vector.broadcast %209 : vector<1x128xf32> to vector<2x128xf32>
    %212 = arith.mulf %211, %210 : vector<2x128xf32>
    %213 = arith.addf %208, %212 : vector<2x128xf32>
    %214 = vector.extract_strided_slice %5 {offsets = [7, 0], sizes = [1, 128], strides = [1, 1]} : vector<8x128xf32> to vector<1x128xf32>
    %215 = vector.extract_strided_slice %179 {offsets = [14, 0], sizes = [2, 128], strides = [1, 1]} : vector<16x128xf32> to vector<2x128xf32>
    %216 = vector.broadcast %214 : vector<1x128xf32> to vector<2x128xf32>
    %217 = arith.mulf %216, %215 : vector<2x128xf32>
    %218 = arith.addf %213, %217 : vector<2x128xf32>
    %c0_34 = arith.constant 0 : index
    %c0_35 = arith.constant 0 : index
    %219 = vector.load %arg8[%c0_34, %c0_35] : memref<16x19xf32, #tpu.memory_space<vmem>>, vector<16x19xf32>
    %cst_36 = arith.constant 0.000000e+00 : f32
    %220 = vector.broadcast %cst_36 : f32 to vector<2x36xf32>
    %221 = tpu.concatenate %220, %218, %220 in 1 : vector<2x36xf32>, vector<2x128xf32>, vector<2x36xf32> -> vector<2x200xf32>
    %222 = vector.extract_strided_slice %4 {offsets = [0, 0], sizes = [1, 128], strides = [1, 1]} : vector<9x128xf32> to vector<1x128xf32>
    %223 = vector.extract_strided_slice %221 {offsets = [0, 0], sizes = [2, 128], strides = [1, 1]} : vector<2x200xf32> to vector<2x128xf32>
    %224 = vector.broadcast %222 : vector<1x128xf32> to vector<2x128xf32>
    %225 = arith.mulf %224, %223 : vector<2x128xf32>
    %226 = vector.extract_strided_slice %4 {offsets = [1, 0], sizes = [1, 128], strides = [1, 1]} : vector<9x128xf32> to vector<1x128xf32>
    %227 = vector.extract_strided_slice %221 {offsets = [0, 4], sizes = [2, 128], strides = [1, 1]} : vector<2x200xf32> to vector<2x128xf32>
    %228 = vector.broadcast %226 : vector<1x128xf32> to vector<2x128xf32>
    %229 = arith.mulf %228, %227 : vector<2x128xf32>
    %230 = vector.extract_strided_slice %4 {offsets = [2, 0], sizes = [1, 128], strides = [1, 1]} : vector<9x128xf32> to vector<1x128xf32>
    %231 = vector.extract_strided_slice %221 {offsets = [0, 8], sizes = [2, 128], strides = [1, 1]} : vector<2x200xf32> to vector<2x128xf32>
    %232 = vector.broadcast %230 : vector<1x128xf32> to vector<2x128xf32>
    %233 = arith.mulf %232, %231 : vector<2x128xf32>
    %234 = vector.extract_strided_slice %4 {offsets = [3, 0], sizes = [1, 128], strides = [1, 1]} : vector<9x128xf32> to vector<1x128xf32>
    %235 = vector.extract_strided_slice %221 {offsets = [0, 32], sizes = [2, 128], strides = [1, 1]} : vector<2x200xf32> to vector<2x128xf32>
    %236 = vector.broadcast %234 : vector<1x128xf32> to vector<2x128xf32>
    %237 = arith.mulf %236, %235 : vector<2x128xf32>
    %238 = vector.extract_strided_slice %4 {offsets = [5, 0], sizes = [1, 128], strides = [1, 1]} : vector<9x128xf32> to vector<1x128xf32>
    %239 = vector.extract_strided_slice %221 {offsets = [0, 40], sizes = [2, 128], strides = [1, 1]} : vector<2x200xf32> to vector<2x128xf32>
    %240 = vector.broadcast %238 : vector<1x128xf32> to vector<2x128xf32>
    %241 = arith.mulf %240, %239 : vector<2x128xf32>
    %242 = vector.extract_strided_slice %4 {offsets = [6, 0], sizes = [1, 128], strides = [1, 1]} : vector<9x128xf32> to vector<1x128xf32>
    %243 = vector.extract_strided_slice %221 {offsets = [0, 64], sizes = [2, 128], strides = [1, 1]} : vector<2x200xf32> to vector<2x128xf32>
    %244 = vector.broadcast %242 : vector<1x128xf32> to vector<2x128xf32>
    %245 = arith.mulf %244, %243 : vector<2x128xf32>
    %246 = vector.extract_strided_slice %4 {offsets = [7, 0], sizes = [1, 128], strides = [1, 1]} : vector<9x128xf32> to vector<1x128xf32>
    %247 = vector.extract_strided_slice %221 {offsets = [0, 68], sizes = [2, 128], strides = [1, 1]} : vector<2x200xf32> to vector<2x128xf32>
    %248 = vector.broadcast %246 : vector<1x128xf32> to vector<2x128xf32>
    %249 = arith.mulf %248, %247 : vector<2x128xf32>
    %250 = vector.extract_strided_slice %4 {offsets = [8, 0], sizes = [1, 128], strides = [1, 1]} : vector<9x128xf32> to vector<1x128xf32>
    %251 = vector.extract_strided_slice %221 {offsets = [0, 72], sizes = [2, 128], strides = [1, 1]} : vector<2x200xf32> to vector<2x128xf32>
    %252 = vector.broadcast %250 : vector<1x128xf32> to vector<2x128xf32>
    %253 = arith.mulf %252, %251 : vector<2x128xf32>
    %254 = tpu.concatenate %225, %229, %233, %237, %218, %241, %245, %249, %253, %2 in 0 : vector<2x128xf32>, vector<2x128xf32>, vector<2x128xf32>, vector<2x128xf32>, vector<2x128xf32>, vector<2x128xf32>, vector<2x128xf32>, vector<2x128xf32>, vector<2x128xf32>, vector<1x128xf32> -> vector<19x128xf32>
    %cst_37 = arith.constant dense<0.000000e+00> : vector<16x128xf32>
    %255 = tpu.matmul %219, %254, %cst_37 {dimension_numbers = #tpu.dot_dimension_numbers<[1], [0], [0], [1], [0, 0, 1, 1], [], []>} : vector<16x19xf32>, vector<19x128xf32>, vector<16x128xf32> -> vector<16x128xf32>
    %cst_38 = arith.constant 0.000000e+00 : f32
    %256 = vector.broadcast %cst_38 : f32 to vector<16x128xf32>
    %257 = arith.maximumf %255, %256 : vector<16x128xf32>
    %258 = vector.extract_strided_slice %5 {offsets = [0, 0], sizes = [1, 128], strides = [1, 1]} : vector<8x128xf32> to vector<1x128xf32>
    %259 = vector.extract_strided_slice %257 {offsets = [0, 0], sizes = [2, 128], strides = [1, 1]} : vector<16x128xf32> to vector<2x128xf32>
    %260 = vector.broadcast %258 : vector<1x128xf32> to vector<2x128xf32>
    %261 = arith.mulf %260, %259 : vector<2x128xf32>
    %262 = vector.extract_strided_slice %5 {offsets = [1, 0], sizes = [1, 128], strides = [1, 1]} : vector<8x128xf32> to vector<1x128xf32>
    %263 = vector.extract_strided_slice %257 {offsets = [2, 0], sizes = [2, 128], strides = [1, 1]} : vector<16x128xf32> to vector<2x128xf32>
    %264 = vector.broadcast %262 : vector<1x128xf32> to vector<2x128xf32>
    %265 = arith.mulf %264, %263 : vector<2x128xf32>
    %266 = arith.addf %261, %265 : vector<2x128xf32>
    %267 = vector.extract_strided_slice %5 {offsets = [2, 0], sizes = [1, 128], strides = [1, 1]} : vector<8x128xf32> to vector<1x128xf32>
    %268 = vector.extract_strided_slice %257 {offsets = [4, 0], sizes = [2, 128], strides = [1, 1]} : vector<16x128xf32> to vector<2x128xf32>
    %269 = vector.broadcast %267 : vector<1x128xf32> to vector<2x128xf32>
    %270 = arith.mulf %269, %268 : vector<2x128xf32>
    %271 = arith.addf %266, %270 : vector<2x128xf32>
    %272 = vector.extract_strided_slice %5 {offsets = [3, 0], sizes = [1, 128], strides = [1, 1]} : vector<8x128xf32> to vector<1x128xf32>
    %273 = vector.extract_strided_slice %257 {offsets = [6, 0], sizes = [2, 128], strides = [1, 1]} : vector<16x128xf32> to vector<2x128xf32>
    %274 = vector.broadcast %272 : vector<1x128xf32> to vector<2x128xf32>
    %275 = arith.mulf %274, %273 : vector<2x128xf32>
    %276 = arith.addf %271, %275 : vector<2x128xf32>
    %277 = vector.extract_strided_slice %5 {offsets = [4, 0], sizes = [1, 128], strides = [1, 1]} : vector<8x128xf32> to vector<1x128xf32>
    %278 = vector.extract_strided_slice %257 {offsets = [8, 0], sizes = [2, 128], strides = [1, 1]} : vector<16x128xf32> to vector<2x128xf32>
    %279 = vector.broadcast %277 : vector<1x128xf32> to vector<2x128xf32>
    %280 = arith.mulf %279, %278 : vector<2x128xf32>
    %281 = arith.addf %276, %280 : vector<2x128xf32>
    %282 = vector.extract_strided_slice %5 {offsets = [5, 0], sizes = [1, 128], strides = [1, 1]} : vector<8x128xf32> to vector<1x128xf32>
    %283 = vector.extract_strided_slice %257 {offsets = [10, 0], sizes = [2, 128], strides = [1, 1]} : vector<16x128xf32> to vector<2x128xf32>
    %284 = vector.broadcast %282 : vector<1x128xf32> to vector<2x128xf32>
    %285 = arith.mulf %284, %283 : vector<2x128xf32>
    %286 = arith.addf %281, %285 : vector<2x128xf32>
    %287 = vector.extract_strided_slice %5 {offsets = [6, 0], sizes = [1, 128], strides = [1, 1]} : vector<8x128xf32> to vector<1x128xf32>
    %288 = vector.extract_strided_slice %257 {offsets = [12, 0], sizes = [2, 128], strides = [1, 1]} : vector<16x128xf32> to vector<2x128xf32>
    %289 = vector.broadcast %287 : vector<1x128xf32> to vector<2x128xf32>
    %290 = arith.mulf %289, %288 : vector<2x128xf32>
    %291 = arith.addf %286, %290 : vector<2x128xf32>
    %292 = vector.extract_strided_slice %5 {offsets = [7, 0], sizes = [1, 128], strides = [1, 1]} : vector<8x128xf32> to vector<1x128xf32>
    %293 = vector.extract_strided_slice %257 {offsets = [14, 0], sizes = [2, 128], strides = [1, 1]} : vector<16x128xf32> to vector<2x128xf32>
    %294 = vector.broadcast %292 : vector<1x128xf32> to vector<2x128xf32>
    %295 = arith.mulf %294, %293 : vector<2x128xf32>
    %296 = arith.addf %291, %295 : vector<2x128xf32>
    %c0_39 = arith.constant 0 : index
    %c0_40 = arith.constant 0 : index
    %297 = vector.load %arg9[%c0_39, %c0_40] : memref<8x3xf32, #tpu.memory_space<vmem>>, vector<8x3xf32>
    %298 = tpu.concatenate %296, %2 in 0 : vector<2x128xf32>, vector<1x128xf32> -> vector<3x128xf32>
    %cst_41 = arith.constant dense<0.000000e+00> : vector<8x128xf32>
    %299 = tpu.matmul %297, %298, %cst_41 {dimension_numbers = #tpu.dot_dimension_numbers<[1], [0], [0], [1], [0, 0, 1, 1], [], []>} : vector<8x3xf32>, vector<3x128xf32>, vector<8x128xf32> -> vector<8x128xf32>
    %300 = arith.mulf %5, %299 : vector<8x128xf32>
    %cst_42 = arith.constant dense<0.000000e+00> : vector<128xf32>
    %301 = vector.multi_reduction <add>, %300, %cst_42 [0] : vector<8x128xf32> to vector<128xf32>
    %302 = vector.shape_cast %301 : vector<128xf32> to vector<1x128xf32>
    %303 = arith.negf %302 : vector<1x128xf32>
    %304 = math.exp %303 : vector<1x128xf32>
    %cst_43 = arith.constant 1.000000e+00 : f32
    %305 = vector.broadcast %cst_43 : f32 to vector<1x128xf32>
    %306 = arith.addf %305, %304 : vector<1x128xf32>
    %307 = arith.divf %305, %306 : vector<1x128xf32>
    %cst_44 = arith.constant 1.000000e+00 : f32
    %308 = vector.broadcast %cst_44 : f32 to vector<1x128xf32>
    %309 = arith.addf %308, %307 : vector<1x128xf32>
    %310 = vector.broadcast %140 : vector<1x128xf32> to vector<32x128xf32>
    %311 = arith.mulf %1, %310 : vector<32x128xf32>
    %cst_45 = arith.constant 0.00999999977 : f32
    %312 = vector.broadcast %cst_45 : f32 to vector<32x128xf32>
    %313 = arith.mulf %312, %311 : vector<32x128xf32>
    %314 = arith.maximumf %311, %313 : vector<32x128xf32>
    %c0_46 = arith.constant 0 : index
    %c0_47 = arith.constant 0 : index
    %c0_48 = arith.constant 0 : index
    %c0_49 = arith.constant 0 : index
    %315 = vector.load %arg13[%c0_46, %c0_47, %c0_48, %c0_49] : memref<1x2x32x128xf32, #tpu.memory_space<vmem>>, vector<1x1x32x128xf32>
    %316 = vector.shape_cast %315 : vector<1x1x32x128xf32> to vector<32x128xf32>
    %317 = vector.shape_cast %314 : vector<32x128xf32> to vector<1x1x32x128xf32>
    tpu.vector_store %arg13[%c0_46, %c0_47, %c0_48, %c0_49], %317 {strides = array<i32>} : memref<1x2x32x128xf32, #tpu.memory_space<vmem>>, vector<1x1x32x128xf32>,
    %318 = vector.broadcast %309 : vector<1x128xf32> to vector<32x128xf32>
    %319 = arith.mulf %1, %318 : vector<32x128xf32>
    %cst_50 = arith.constant 0.00999999977 : f32
    %320 = vector.broadcast %cst_50 : f32 to vector<32x128xf32>
    %321 = arith.mulf %320, %319 : vector<32x128xf32>
    %322 = arith.maximumf %319, %321 : vector<32x128xf32>
    %c0_51 = arith.constant 0 : index
    %c1 = arith.constant 1 : index
    %c0_52 = arith.constant 0 : index
    %c0_53 = arith.constant 0 : index
    %323 = vector.load %arg13[%c0_51, %c1, %c0_52, %c0_53] : memref<1x2x32x128xf32, #tpu.memory_space<vmem>>, vector<1x1x32x128xf32>
    %324 = vector.shape_cast %323 : vector<1x1x32x128xf32> to vector<32x128xf32>
    %325 = vector.shape_cast %322 : vector<32x128xf32> to vector<1x1x32x128xf32>
    tpu.vector_store %arg13[%c0_51, %c1, %c0_52, %c0_53], %325 {strides = array<i32>} : memref<1x2x32x128xf32, #tpu.memory_space<vmem>>, vector<1x1x32x128xf32>,
    return
  }
  func.func @transform_0(%arg0: i32) -> (i32, i32, i32) {
    %c0_i32 = arith.constant 0 : i32
    %c0_i32_0 = arith.constant 0 : i32
    %c0_i32_1 = arith.constant 0 : i32
    return %arg0, %c0_i32, %c0_i32_0 : i32, i32, i32
  }
  func.func @transform_1(%arg0: i32) -> (i32, i32) {
    %c0_i32 = arith.constant 0 : i32
    %c0_i32_0 = arith.constant 0 : i32
    %c0_i32_1 = arith.constant 0 : i32
    return %c0_i32, %c0_i32_0 : i32, i32
  }
  func.func @transform_2(%arg0: i32) -> (i32, i32) {
    %c0_i32 = arith.constant 0 : i32
    %c0_i32_0 = arith.constant 0 : i32
    %c0_i32_1 = arith.constant 0 : i32
    return %c0_i32, %c0_i32_0 : i32, i32
  }
  func.func @transform_3(%arg0: i32) -> (i32, i32) {
    %c0_i32 = arith.constant 0 : i32
    %c0_i32_0 = arith.constant 0 : i32
    %c0_i32_1 = arith.constant 0 : i32
    return %c0_i32, %c0_i32_0 : i32, i32
  }
  func.func @transform_4(%arg0: i32) -> (i32, i32) {
    %c0_i32 = arith.constant 0 : i32
    %c0_i32_0 = arith.constant 0 : i32
    %c0_i32_1 = arith.constant 0 : i32
    return %c0_i32, %c0_i32_0 : i32, i32
  }
  func.func @transform_5(%arg0: i32) -> (i32, i32) {
    %c0_i32 = arith.constant 0 : i32
    %c0_i32_0 = arith.constant 0 : i32
    %c0_i32_1 = arith.constant 0 : i32
    return %c0_i32, %c0_i32_0 : i32, i32
  }
  func.func @transform_6(%arg0: i32) -> (i32, i32) {
    %c0_i32 = arith.constant 0 : i32
    %c0_i32_0 = arith.constant 0 : i32
    %c0_i32_1 = arith.constant 0 : i32
    return %c0_i32, %c0_i32_0 : i32, i32
  }
  func.func @transform_7(%arg0: i32) -> (i32, i32) {
    %c0_i32 = arith.constant 0 : i32
    %c0_i32_0 = arith.constant 0 : i32
    %c0_i32_1 = arith.constant 0 : i32
    return %c0_i32, %c0_i32_0 : i32, i32
  }
  func.func @transform_8(%arg0: i32) -> (i32, i32) {
    %c0_i32 = arith.constant 0 : i32
    %c0_i32_0 = arith.constant 0 : i32
    %c0_i32_1 = arith.constant 0 : i32
    return %c0_i32, %c0_i32_0 : i32, i32
  }
  func.func @transform_9(%arg0: i32) -> (i32, i32) {
    %c0_i32 = arith.constant 0 : i32
    %c0_i32_0 = arith.constant 0 : i32
    %c0_i32_1 = arith.constant 0 : i32
    return %c0_i32, %c0_i32_0 : i32, i32
  }
  func.func @transform_10(%arg0: i32) -> (i32, i32) {
    %c0_i32 = arith.constant 0 : i32
    %c0_i32_0 = arith.constant 0 : i32
    %c0_i32_1 = arith.constant 0 : i32
    return %c0_i32, %c0_i32_0 : i32, i32
  }
  func.func @transform_11(%arg0: i32) -> (i32, i32) {
    %c0_i32 = arith.constant 0 : i32
    %c0_i32_0 = arith.constant 0 : i32
    %c0_i32_1 = arith.constant 0 : i32
    return %c0_i32, %c0_i32_0 : i32, i32
  }
  func.func @transform_12(%arg0: i32) -> (i32, i32, i32, i32) {
    %c0_i32 = arith.constant 0 : i32
    %c0_i32_0 = arith.constant 0 : i32
    %c0_i32_1 = arith.constant 0 : i32
    %c0_i32_2 = arith.constant 0 : i32
    return %arg0, %c0_i32, %c0_i32_0, %c0_i32_1 : i32, i32, i32, i32
  }
}

</mosaic_0001>

<bundles_post_ra>
// kernel: tpu_custom_call.1
= control target key start
LH: loop header
LB: loop body
LE: loop exit
PB: predicated region body
PF: predicated region fallthrough
CT: control target
= control target key end

     0   :  { %s3130_s0 = inlined_call_operand.hbm [shape: f32[2,32,128], index: 0, kind: input, shape index: {}]   ;;  %s3131_s1 = inlined_call_operand.vmem [shape: f32[18,32], index: 1, kind: input, shape index: {}]   ;;  %s3132_s2 = inlined_call_operand.vmem [shape: f32[18,1], index: 2, kind: input, shape index: {}]   ;;  %s3133_s3 = inlined_call_operand.hbm [shape: f32[2,19], index: 3, kind: input, shape index: {}]   ;;  %s3134_s4 = inlined_call_operand.hbm [shape: f32[2,19], index: 4, kind: input, shape index: {}]   ;;  %s3135_s5 = inlined_call_operand.vmem [shape: f32[1,3], index: 5, kind: input, shape index: {}]   ;;  %s3136_s6 = inlined_call_operand.vmem [shape: f32[16,19], index: 6, kind: input, shape index: {}]   ;;  %s3137_s7 = inlined_call_operand.hbm [shape: f32[16,19], index: 7, kind: input, shape index: {}]   ;;  %s3138_s8 = inlined_call_operand.vmem [shape: f32[8,3], index: 8, kind: input, shape index: {}]   ;;  %s3139_s9 = inlined_call_operand.hbm [shape: f32[9,128], index: 9, kind: input, shape index: {}]   ;;  %s3140_s10 = inlined_call_operand.hbm [shape: f32[9,128], index: 10, kind: input, shape index: {}]   ;;  %s3141_s11 = inlined_call_operand.vmem [shape: f32[8,128], index: 11, kind: input, shape index: {}]   ;;  %s3142_s12 = inlined_call_operand.hbm [shape: f32[2,2,32,128], index: 12, kind: output, shape index: {}]  }
   0x1   :  { %3151 = sst [smem:[#allocation21_spill]] %s3133_s3 }
   0x2   :  { %3152 = sst [smem:[#allocation22_spill]] %s3134_s4 }
   0x3   :  { %3153 = sst [smem:[#allocation23_spill]] %s3137_s7 }
   0x4   :  { %3154 = sst [smem:[#allocation24_spill]] %s3139_s9 }
   0x5   :  { %3155 = sst [smem:[#allocation25_spill]] %s3140_s10 }
   0x6   :  { %17 = vsyncpa [#allocation3], 0 }
   0x7   :  { %19 = vsyncpa [#allocation3 + $0x1], 0 }
   0x8   :  { %20 = vsyncpa [#allocation6], 0 }
   0x9   :  { %21 = vsyncpa [#allocation9], 0 }
   0xa   :  { %22 = vsyncpa [#allocation12], 0 }
   0xb   :  { %23 = vsyncpa [#allocation4], 0 }
   0xc   :  { %25 = vsyncpa [#allocation4 + $0x1], 0  ;;  %s2437_s21 = smov 0   ;;  %s2439_s22 = smov 0  }
   0xd   :  { %s2441_s23 = smov 0   ;;  %s2443_s24 = smov 0  }
   0xe LB: > { %3156 = sst [smem:[#allocation19_spill]] %s2344_s23  ;;  %s2350_s25 = smov [#allocation5]   ;;  %s2348_s24 = sphi %s2443_s24, %s3187_s24   ;;  %s2344_s23 = sphi %s2441_s23, %s3184_s23   ;;  %s2340_s22 = sphi %s2439_s22, %s3186_s22   ;;  %s2336_s21 = sphi %s2437_s21, %s3185_s21  }
   0xf   : > { %s338_s26 = sshll.u32 %s2350_s25, 4  ;;  %s2458_s27 = sadd.s32 4294967295, %s2348_s24   ;;  %s339_s26 = int_to_ptr.vmem [resolvable:$true] %s338_s26 }
  0x10   : > { %p1849_p0 = scmp.ge.s32.totalorder %s2348_s24, 1  ;;  %p3146_p1 = scmp.eq.s32.totalorder %s2458_s27, 0 }
  0x11   : > { %p319_p2 = scmp.lt.s32.totalorder %s2348_s24, 3  ;;  %s2351_s29 = smov [#allocation8]  }
  0x12   : > { %s365_s30 = sshll.u32 %s2351_s29, 4  ;;  %s2352_s14 = smov [#allocation7]   ;;  %s2470_s30 = int_to_ptr.vmem [resolvable:$true] %s365_s30 }
  0x13   : > { %p2463_p3 = pnand %p1849_p0, %p319_p2  ;;  %s349_s15 = sshll.u32 %s2352_s14, 4  ;;  %s2478_s15 = int_to_ptr.vmem [resolvable:$true] %s349_s15 }
  0x14   : > { %s2125_s17 = scalar_lea.vmem %s339_s26, 32  ;;  %p2133_p11 = scmp.lt.s32.totalorder %s339_s26, %s339_s26 }
  0x15   : > { %s3157_s28 = scalar_select %p2463_p3, 1, 0 }
  0x16   : > { %p2015_p5 = pneg %p2463_p3  ;;  %p2126_p8 = scmp.ne.s32.totalorder %s339_s26, %s2125_s17 }
  0x17   : > { %p2134_p12 = scmp.lt.s32.totalorder %s2125_s17, %s2125_s17 }
  0x18   : > { %p2474_p6 = pnand %p2015_p5, %p3146_p1 }
  0x19   : > { %p2135_p13 = por %p2134_p12, %p2133_p11 }
  0x1a   : > { %p2482_p7 = pneg %p2474_p6 }
  0x1c   : > { %p2128_p9 = pnand %p2126_p8, %p2482_p7 }
  0x1e   : > { %p2129_p10 = pneg %p2128_p9 }
  0x20   : > { %p2136_p0 = pnand %p2135_p13, %p2129_p10 }
  0x22   : > { %2139 = shalt.err (!%p2136_p0)
}
  0x23   : > { %s3160_s3 = sld [smem:[#allocation21_spill]]  ;;  %s2151_s20 = scalar_lea.vmem %s2470_s30, 256 }
  0x24   : > { %p2152_p2 = scmp.ne.s32.totalorder %s2470_s30, %s2151_s20  ;;  %p2159_p9 = scmp.lt.s32.totalorder %s2470_s30, %s2470_s30 }
  0x25   : > { %p2160_p11 = scmp.lt.s32.totalorder %s2151_s20, %s2151_s20 }
  0x26   : > { %p2154_p5 = pnand %p2152_p2, %p2482_p7 }
  0x27   : > { %p2161_p10 = por %p2160_p11, %p2159_p9 }
  0x28   : > { %p2155_p8 = pneg %p2154_p5 }
  0x29   : > { %2018 = dma.hbm_to_vmem [thread:$0]  (!%p2474_p6), %s3160_s3, 32, %s339_s26, [#allocation6]  }
  0x2a   : > { %p2162_p12 = pnand %p2161_p10, %p2155_p8 }
  0x2c   : > { %2165 = shalt.err (!%p2162_p12)
}
  0x2d   : > { %s3143_s25 = smov 128   ;;  %s3145_s29 = smov 8  }
  0x2e   : > { %s3161_s7 = sld [smem:[#allocation23_spill]]  ;;  %s2177_s17 = scalar_lea.vmem %s2478_s15, 32 }
  0x2f   : > { %p2178_p13 = scmp.ne.s32.totalorder %s2478_s15, %s2177_s17  ;;  %p2185_p5 = scmp.lt.s32.totalorder %s2478_s15, %s2478_s15 }
  0x30   : > { %p2186_p8 = scmp.lt.s32.totalorder %s2177_s17, %s2177_s17 }
  0x31   : > { %p2180_p0 = pnand %p2178_p13, %p2482_p7 }
  0x32   : > { %p2187_p9 = por %p2186_p8, %p2185_p5 }
  0x33   : > { %p2181_p2 = pneg %p2180_p0 }
  0x34   : > { %2024 = dma.hbm_to_vmem [thread:$0]  (!%p2474_p6), %s3161_s7, 256, %s2470_s30, [#allocation9], %s3143_s25, %s3143_s25, %s3145_s29  }
  0x35   : > { %p2188_p11 = pnand %p2187_p9, %p2181_p2 }
  0x37   : > { %2191 = shalt.err (!%p2188_p11)
}
  0x38   : > { %s3162_s4 = sld [smem:[#allocation22_spill]]  ;;  %s2355_s30 = smov [#allocation10]  }
  0x39   : > { %s381_s20 = sshll.u32 %s2355_s30, 4  ;;  %s2356_s26 = smov [#allocation11]   ;;  %s382_s20 = int_to_ptr.vmem [resolvable:$true] %s381_s20 }
  0x3a   : > { %s394_s14 = sshll.u32 %s2356_s26, 4  ;;  %s2203_s25 = scalar_lea.vmem %s382_s20, 256  ;;  %s395_s14 = int_to_ptr.vmem [resolvable:$true] %s394_s14 }
  0x3b   : > { %p2204_p10 = scmp.ne.s32.totalorder %s382_s20, %s2203_s25  ;;  %p2211_p0 = scmp.lt.s32.totalorder %s382_s20, %s382_s20 }
  0x3c   : > { %p2212_p2 = scmp.lt.s32.totalorder %s2203_s25, %s2203_s25 }
  0x3d   : > { %p2206_p12 = pnand %p2204_p10, %p2482_p7 }
  0x3e   : > { %2021 = dma.hbm_to_vmem [thread:$0]  (!%p2474_p6), %s3162_s4, 32, %s2478_s15, [#allocation6]  }
  0x3f   : > { %p2207_p13 = pneg %p2206_p12  ;;  %p2213_p5 = por %p2212_p2, %p2211_p0 }
  0x41   : > { %p2214_p8 = pnand %p2213_p5, %p2207_p13 }
  0x43   : > { %2217 = shalt.err (!%p2214_p8)
}
  0x44   : > { %s3163_s17 = smov 128   ;;  %s3164_s9 = sld [smem:[#allocation24_spill]] }
  0x45   : > { %s2229_s19 = scalar_lea.vmem %s395_s14, 256  ;;  %p2237_p12 = scmp.lt.s32.totalorder %s395_s14, %s395_s14 }
  0x46   : > { %p2230_p9 = scmp.ne.s32.totalorder %s395_s14, %s2229_s19  ;;  %p2238_p0 = scmp.lt.s32.totalorder %s2229_s19, %s2229_s19 }
  0x48   : > { %p2232_p11 = pnand %p2230_p9, %p2482_p7  ;;  %p2239_p13 = por %p2238_p0, %p2237_p12 }
  0x4a   : > { %2027 = dma.hbm_to_vmem [thread:$0]  (!%p2474_p6), %s3164_s9, 256, %s382_s20, [#allocation9], %s3163_s17, %s3163_s17, %s3145_s29  }
  0x4b   : > { %p2233_p10 = pneg %p2232_p11 }
  0x4d   : > { %p2240_p2 = pnand %p2239_p13, %p2233_p10 }
  0x4f   : > { %2243 = shalt.err (!%p2240_p2)
}
  0x50   : > { %s3165_s10 = sld [smem:[#allocation25_spill]]  ;;  %s1848_s13 = sadd.s32 4294967294, %s2348_s24  }
  0x51   : > { %s2542_s16 = sadd.s32 1, %s2348_s24   ;;  %s38_s20 = sadd.s32 1, %s2344_s23 }
  0x52   : > { %s35_s26 = ssub.s32 %s2348_s24, %s2542_s16  ;;  %p45_p7 = scmp.ne.s32.totalorder %s2344_s23, %s2340_s22 }
  0x53   : > { %p36_p5 = scmp.eq.s32.totalorder %s35_s26, 0  ;;  %p46_p8 = scmp.eq.s32.totalorder %s2348_s24, 0 }
  0x54   : > { %p51_p9 = scmp.ne.s32.totalorder %s2340_s22, %s2336_s21  ;;  %p306_p11 = scmp.eq.s32.totalorder %s2458_s27, 1 }
  0x55   : > { %s2554_s15 = scalar_select %p36_p5, %s2344_s23, %s38_s20  }
  0x56   : > { %2030 = dma.hbm_to_vmem [thread:$0]  (!%p2474_p6), %s3165_s10, 256, %s395_s14, [#allocation12], %s3163_s17, %s3163_s17, %s3145_s29  }
  0x57   : > { %3166 = sst [smem:[#allocation20_spill]] %s2554_s15  ;;  %p47_p10 = por %p46_p8, %p45_p7 }
  0x58   : > { %p2558_p12 = por %p3146_p1, %p51_p9  ;;  %p2562_p6 = por %p306_p11, %p45_p7 }
  0x59   : > { %p312_p0 = scmp.eq.s32.totalorder %s1848_s13, 1  ;;  %p2044_p13 = scmp.lt.s32.totalorder %s2348_s24, 2 }
  0x5a   : > { %s3167_s18 = scalar_select %p2558_p12, 1, 0 }
  0x5b   : > { %s3168_s14 = scalar_select %p2562_p6, 1, 0 }
  0x5c   : > { %s411_s19 = sand.u32 1, %s2344_s23   ;;  %p2568_p2 = por %p312_p0, %p51_p9 }
  0x5d   : > { %s1856_s30 = sshll.u32 %s411_s19, 5  ;;  %s1897_s20 = sshll.u32 %s2348_s24, 9 }
  0x5e   : > { %s3169_s25 = scalar_select %p2568_p2, 1, 0 }
  0x5f   : > { %s2576_s3 = scalar_lea.hbm %s3130_s0, %s1897_s20  ;;  %s415_s4 = scalar_lea.vmem [#allocation2], %s1856_s30 }
  0x60   : > { %s422_s7 = sshll.u32 %s415_s4, 4  ;;  %p2578_p7 = pnand %p2044_p13, %p47_p10  ;;  %s2582_s7 = int_to_ptr.vmem [resolvable:$true] %s422_s7 }
  0x61   : > { %s2584_s9 = scalar_lea.sflag [#allocation3], %s411_s19  ;;  %s2244_s10 = scalar_lea.hbm %s2576_s3, 512 }
  0x62   : > { %p2245_p5 = scmp.ne.s32.totalorder %s2576_s3, %s2244_s10  ;;  %p2246_p8 = pneg %p2578_p7 }
  0x63   : > { %s2249_s30 = scalar_lea.hbm %s3130_s0, 1024  ;;  %p2250_p10 = scmp.lt.s32.totalorder %s2576_s3, %s3130_s0 }
  0x64   : > { %p2247_p9 = pnand %p2246_p8, %p2245_p5  ;;  %p2251_p0 = scmp.lt.s32.totalorder %s2249_s30, %s2244_s10 }
  0x66   : > { %p2248_p11 = pneg %p2247_p9  ;;  %p2252_p13 = por %p2251_p0, %p2250_p10 }
  0x68   : > { %p2253_p4 = pnand %p2252_p13, %p2248_p11 }
  0x6a   : > { %2256 = shalt.err (!%p2253_p4)
}
  0x6b   : > { %s2257_s19 = scalar_lea.vmem %s2582_s7, 512  ;;  %s2357_s15 = smov [#allocation2]  }
  0x6c   : > { %p2258_p1 = scmp.ne.s32.totalorder %s2582_s7, %s2257_s19  ;;  %s2262_s23 = sshll.u32 %s2357_s15, 4  ;;  %s2263_s23 = int_to_ptr.vmem [resolvable:$false] %s2262_s23 }
  0x6d   : > { %s2264_s29 = scalar_lea.vmem %s2263_s23, 1024  ;;  %p2265_p9 = scmp.lt.s32.totalorder %s2582_s7, %s2263_s23 }
  0x6e   : > { %p2260_p2 = pnand %p2258_p1, %p2246_p8  ;;  %p2266_p6 = scmp.lt.s32.totalorder %s2264_s29, %s2257_s19 }
  0x70   : > { %p2261_p5 = pneg %p2260_p2  ;;  %p2267_p12 = por %p2266_p6, %p2265_p9 }
  0x72   : > { %p2268_p3 = pnand %p2267_p12, %p2261_p5 }
  0x74   : > { %2271 = shalt.err (!%p2268_p3)
}
  0x75   : > { %s3171_s10 = smov 8   ;;  %p3172_p1 = scmp.ne.s32.totalorder %s3157_s28, 0 }
  0x76   : > { %2034 = dma.hbm_to_vmem [thread:$0]  (!%p2578_p7), %s2576_s3, 512, %s2582_s7, %s2584_s9, %s3163_s17, %s3163_s17, %s3171_s10  }
  0x77   : > { %434 = sbr.rel (%p3172_p1) target bundleno = 1847 (0x737), region = 68  ;;  %s2611_s15 = sand.u32 (!%p3172_p1), 1, %s2340_s22  }
  0x78   : > { %s1860_s23 = sshll.u32 (!%p3172_p1), %s2611_s15, 5  ;;  %s437_s20 = scalar_lea.sflag (!%p3172_p1), [#allocation3], %s2611_s15 }
  0x79   : > { %s2615_s30 = scalar_lea.vmem (!%p3172_p1), [#allocation2], %s1860_s23  ;;  %p3173_p3 = scmp.ne.s32.totalorder (!%p3172_p1), %s3167_s18, 0 }
  0x7c   : > { %2315 = dma.done.wait (%p3173_p3), %s437_s20, 512  }
  0x7d   : > { %2317 = vsyncadd (%p3173_p3), %s437_s20, 4294966784  ;;  %p3174_p4 = scmp.eq.s32.totalorder %s2458_s27, 0 }
  0x7f   : > { %2319 = dma.done.wait (%p3174_p4), [#allocation6], 64   ;;  %p3175_p12 = pmov %p3174_p4 }
  0x80   : > { %p3176_p6 = pmov %p3174_p4 }
  0x81   : > { %2321 = vsyncadd (%p3175_p12), [#allocation6], 4294967232 }
  0x82   : > { %2323 = dma.done.wait (%p3176_p6), [#allocation9], 512   ;;  %p3177_p2 = pmov %p3174_p4 }
  0x84   : > { %2325 = vsyncadd (%p3177_p2), [#allocation9], 4294966784  ;;  %p3178_p7 = pmov %p3177_p2 }
  0x85   : > { %p3179_p8 = pmov %p3177_p2 }
  0x86   : > { %2327 = dma.done.wait (%p3178_p7), [#allocation12], 256  }
  0x87   : > { %2329 = vsyncadd (%p3179_p8), [#allocation12], 4294967040  ;;  %v2358_v0 = vmov 0.0   ;;  %vm2359_vm0 = vmmov 0   ;;  %v2360_v1 = vmov 0   ;;  %v2640_v2 = vld [vmem:[%s2615_s30 + $0x18] sm:$0xff]  ;;  %v624_v26 = vlaneseq }
  0x88   : > { %1928 = vmatprep.subr.mxu0 %v2358_v0  ;;  %1936 = vmatprep.mubr.msk.f32.mxu0 %vm2359_vm0, %v2358_v0  ;;  %v2643_v3 = vld [vmem:[%s2615_s30 + $0x10] sm:$0xff]  ;;  %v513_v4 = vld [vmem:[%s3132_s2] sm:$0xff]  ;;  %v2651_v5 = vld [vmem:[%s2615_s30 + $0x8] sm:$0xff]  ;;  %vm531_vm1 = vcmask 261120   ;;  %s2361_s26 = smov 36   ;;  %vm694_vm2 = vcmask 293888  }
  0x89   : > { %2103 = vset.pattern.permute.xlu0 %v2360_v1  ;;  %2104 = vset.pattern.permute.xlu1 %v2360_v1  ;;  %v2656_v6 = vld [vmem:[%s2615_s30] sm:$0xff]  ;;  %v511_v8 = vld [vmem:[%s3131_s1 + $0x8] sm:$0xff]  ;;  %v512_v9 = vld [vmem:[%s3131_s1 + $0x10] sm:$0x3]  ;;  %s2362_s19 = smov 64   ;;  %s2363_s29 = smov 88  }
  0x8a   : > { %1945 = vmatprep.subr.mxu1 %v2358_v0  ;;  %1951 = vmatprep.mubr.msk.f32.mxu1 %vm2359_vm0, %v2358_v0  ;;  %v510_v7 = vld [vmem:[%s3131_s1] sm:$0xff]  ;;  %s2364_s10 = smov 124   ;;  %s2365_s23 = smov 60   ;;  %v514_v20 = vld [vmem:[%s3132_s2 + $0x8] sm:$0xff]  ;;  %v515_v23 = vld [vmem:[%s3132_s2 + $0x10] sm:$0x3] }
  0x8b   : > { %1929 = vmatpush3.msra.mxu0 %v2640_v2  ;;  %518 = vperm.xlu0 %2103, %v513_v4   ;;  %s2366_s20 = smov 56   ;;  %s2367_s3 = smov 120   ;;  %v2713_v29 = vshrl.u32 %v624_v26, 7  ;;  %vm748_vm3 = vcmask 719872   ;;  %v505_v35 = vld [vmem:[#allocation10] sm:$0xff]  ;;  %vm760_vm4 = vcmask 523264  }
  0x8c   : > { %1930 = vmatprep.subr.mxu0 %v2358_v0  ;;  %s2368_s7 = smov 96   ;;  %vm772_vm5 = vcmask 490496   ;;  %vm712_vm6 = vcmask 1014784   ;;  %vm784_vm7 = vcmask 457728   ;;  %v2745_v50 = vld [vmem:[#allocation10 + $0x8] ss:$0 sm:$0xff] }
  0x8d   : > { %1931 = vmatpush3.msra.mxu0 %v2643_v3  ;;  %v2716_v30 = vsub.s32 5, %v2713_v29  ;;  %v2719_v32 = vsub.s32 6, %v2713_v29  ;;  %v2722_v34 = vsub.s32 7, %v2713_v29  ;;  %v2738_v46 = vsub.s32 1, %v2713_v29  ;;  %v2756_v55 = vld [vmem:[%s3141_s11] sm:$0xff]  ;;  %p3180_p10 = scmp.ne.s32.totalorder %s3168_s14, 0 }
  0x8e   : > { %1932 = vmatprep.subr.mxu0 %v2358_v0  ;;  %v2743_v49 = vsub.s32 2, %v2713_v29  ;;  %vm806_vm8 = vcmask 1041408   ;;  %vm808_vm9 = vcmask 1043456   ;;  %vm724_vm10 = vcmask 982016   ;;  %s2369_s28 = smov [#allocation13]  }
  0x8f   : > { %1933 = vmatpush3.msra.mxu0 %v2651_v5  ;;  %v2725_v36 = vrot.slane %v505_v35, %v2716_v30  ;;  %v2729_v39 = vrot.slane %v505_v35, %v2719_v32  ;;  %v2733_v41 = vrot.slane %v505_v35, %v2722_v34  ;;  %v2748_v52 = vrot.slane %v505_v35, %v2738_v46  ;;  %s2276_s17 = sshll.u32 %s2369_s28, 4  ;;  %s2277_s17 = int_to_ptr.vmem [resolvable:$false] %s2276_s17 }
  0x90   : > { %1934 = vmatprep.subr.mxu0 %v2358_v0  ;;  %v2751_v54 = vrot.slane %v505_v35, %v2743_v49  ;;  %vm820_vm11 = vcmask 1042432   ;;  %v2762_v62 = vsub.s32 3, %v2713_v29  ;;  %v2765_v63 = vsub.s32 0, %v2713_v29  ;;  %s2278_s18 = scalar_lea.vmem %s2277_s17, 2048 }
  0x91   : > { %1935 = vmatpush3.msra.mxu0 %v2656_v6  ;;  %vm810_vm12 = vcmask 1045504   ;;  %v2769_v1 = vrot.slane %v2756_v55, %v2738_v46  ;;  %vm736_vm13 = vcmask 785408   ;;  %vm816_vm14 = vcmask 154624  }
  0x92   : > { %1937 = vmatmul.mubr.msk.f32.vlgmr.msra.gmra.mxu0 %vm531_vm1, %v510_v7  ;;  %vm1058_vm15 = vcmask 23552  }
  0x93   : > { %1939 = vmatprep.mubr.msk.f32.mxu0 %vm2359_vm0, %v2358_v0 }
  0x96   : > { %1940 = vmatmul.mubr.msk.f32.gmra.mxu0 %vm531_vm1, %v511_v8 }
  0x97   : > { %1942 = vmatprep.mubr.msk.f32.mxu0 %vm2359_vm0, %v2358_v0 }
  0x9a   : > { %1943 = vmatmul.mubr.msk.f32.gmra.mxu0 %vm531_vm1, %v512_v9 }
 0x106   : > { %v519_v10 = vpop.permute.xlu0 %518 }
 0x152   : > { %v607_v11 = vpop.f32.mrf.mxu0 }
 0x153   : > { %v608_v12 = vadd.f32 %v607_v11, %v519_v10 }
 0x154   : > { %v1938_v13 = vpop.f32.mrf.mxu0 }
 0x155   : > { %v2674_v14 = vmax.f32 %v608_v12, 0.0  ;;  %v2779_v12 = vrot.slane %v505_v35, %v2765_v63 }
 0x156   : > { %v2698_v18 = vpop.f32.mrf.mxu0 }
 0x157   : > { %691 = vrot.lane.b32.xlu0 %v2674_v14, %s2361_s26 }
 0x158   : > { %v1941_v19 = vpop.f32.mrf.mxu0 }
 0x15a   : > { %v2707_v21 = vpop.f32.mrf.mxu0 }
 0x15c   : > { %v1944_v22 = vpop.f32.mrf.mxu0 }
 0x1c9   : > { %v692_v15 = vpop.permute.xlu0 %691 }
 0x1ca   : > { %v2679_v16 = vsel %vm694_vm2, 0.0, %v692_v15  ;;  %v696_v17 = vsel %vm694_vm2, %v692_v15, 0.0 }
 0x1cb   : > { %756 = vrot.lane.b32.xlu0 %v2679_v16, %s2362_s19  ;;  %744 = vrot.lane.b32.xlu1 %v2679_v16, %s2363_s29 }
 0x1cf   : > { %708 = vrot.lane.b32.xlu0 %v2679_v16, %s2364_s10  ;;  %746 = vrot.lane.b32.xlu1 %v696_v17, %s2363_s29 }
 0x1d3   : > { %768 = vrot.lane.b32.xlu0 %v2679_v16, %s2365_s23  ;;  %758 = vrot.lane.b32.xlu1 %v696_v17, %s2362_s19 }
 0x1d7   : > { %780 = vrot.lane.b32.xlu0 %v2679_v16, %s2366_s20  ;;  %710 = vrot.lane.b32.xlu1 %v696_v17, %s2364_s10 }
 0x1db   : > { %720 = vrot.lane.b32.xlu0 %v2679_v16, %s2367_s3  ;;  %770 = vrot.lane.b32.xlu1 %v696_v17, %s2365_s23 }
 0x1df   : > { %732 = vrot.lane.b32.xlu0 %v2679_v16, %s2368_s7  ;;  %782 = vrot.lane.b32.xlu1 %v696_v17, %s2366_s20 }
 0x1e3   : > { %523 = vperm.xlu0 %2103, %v514_v20   ;;  %722 = vrot.lane.b32.xlu1 %v696_v17, %s2367_s3 }
 0x1e7   : > { %734 = vrot.lane.b32.xlu1 %v696_v17, %s2368_s7  ;;  %v2785_v17 = vrot.slane %v505_v35, %v2762_v62 }
 0x1eb   : > { %528 = vperm.xlu1 %2104, %v515_v23   ;;  %v633_v23 = vmul.f32 %v2769_v1, %v2674_v14 }
 0x1ed   : > { %v635_v35 = vrot.slane %v633_v23, 2 }
 0x23d   : > { %v757_v24 = vpop.permute.xlu0 %756  ;;  %v745_v25 = vpop.permute.xlu1 %744 }
 0x241   : > { %v709_v27 = vpop.permute.xlu0 %708  ;;  %v747_v28 = vpop.permute.xlu1 %746 }
 0x242   : > { %v749_v38 = vsel %vm748_vm3, %v745_v25, %v747_v28  ;;  %v2796_v25 = vrot.slane %v2756_v55, %v2743_v49 }
 0x243   : > { %v751_v42 = vmul.f32 %v749_v38, %v2725_v36 }
 0x245   : > { %v759_v31 = vpop.permute.xlu1 %758  ;;  %v769_v33 = vpop.permute.xlu0 %768  ;;  %v798_v51 = vrot.slane %v751_v42, 6  ;;  %v642_v42 = vmul.f32 %v2796_v25, %v2674_v14 }
 0x246   : > { %v761_v40 = vsel %vm760_vm4, %v757_v24, %v759_v31  ;;  %v2792_v24 = vrot.slane %v2756_v55, %v2765_v63  ;;  %v701_v31 = vmul.f32 %v2779_v12, %v2679_v16  ;;  %v658_v16 = vsub.s32 4, %v2713_v29 }
 0x247   : > { %v763_v45 = vmul.f32 %v761_v40, %v2729_v39  ;;  %v812_v9 = vsel %vm806_vm8, %v2674_v14, %v798_v51  ;;  %v2817_v51 = vrot.slane %v2756_v55, %v2716_v30 }
 0x248   : > { %v628_v38 = vmul.f32 %v2792_v24, %v2674_v14  ;;  %v2824_v29 = vrot.slane %v2756_v55, %v658_v16 }
 0x249   : > { %v711_v37 = vpop.permute.xlu1 %710  ;;  %v781_v43 = vpop.permute.xlu0 %780  ;;  %v801_v56 = vrot.slane %v763_v45, 4  ;;  %v2810_v45 = vrot.slane %v2756_v55, %v2762_v62 }
 0x24a   : > { %v713_v57 = vsel %vm712_vm6, %v709_v27, %v711_v37 }
 0x24b   : > { %v715_v4 = vmul.f32 %v713_v57, %v2748_v52  ;;  %v813_v11 = vsel %vm808_vm9, %v812_v9, %v801_v56  ;;  %v2829_v57 = vrot.slane %v2756_v55, %v2719_v32 }
 0x24d   : > { %v771_v44 = vpop.permute.xlu1 %770  ;;  %v721_v59 = vpop.permute.xlu0 %720  ;;  %v789_v19 = vrot.slane %v715_v4, 6 }
 0x24e   : > { %v773_v47 = vsel %vm772_vm5, %v769_v33, %v771_v44  ;;  %v689_v44 = vld [vmem:[#allocation5] sm:$0x3] }
 0x24f   : > { %v775_v48 = vmul.f32 %v773_v47, %v2733_v41  ;;  %v807_v37 = vsel %vm806_vm8, %v701_v31, %v789_v19 }
 0x251   : > { %v783_v53 = vpop.permute.xlu1 %782  ;;  %v804_v60 = vrot.slane %v775_v48, 2  ;;  %v733_v20 = vpop.permute.xlu0 %732 }
 0x252   : > { %v785_v58 = vsel %vm784_vm7, %v781_v43, %v783_v53  ;;  %v637_v53 = vadd.f32 %v635_v35, %v628_v38  ;;  %v1142_v35 = vld [vmem:[%s3136_s6] sm:$0xff] }
 0x253   : > { %v787_v61 = vmul.f32 %v2745_v50, %v785_v58  ;;  %v814_v15 = vsel %vm810_vm12, %v813_v11, %v804_v60  ;;  %1974 = vmatprep.mubr.msk.f32.mxu0 %vm816_vm14, %v1142_v35 }
 0x255   : > { %v723_v7 = vpop.permute.xlu1 %722  ;;  %v815_v8 = vsel %vm806_vm8, %v787_v61, 1.0  ;;  %v2834_v61 = vrot.slane %v2756_v55, %v2722_v34 }
 0x256   : > { %v725_v10 = vsel %vm724_vm10, %v721_v59, %v723_v7  ;;  %1946 = vmatpush3.msk.msra.mxu1 %vm820_vm11, %v815_v8 }
 0x257   : > { %v727_v13 = vmul.f32 %v725_v10, %v2751_v54  ;;  %1947 = vmatprep.subr.mxu1 %v2358_v0 }
 0x258   : > { %1948 = vmatpush3.msra.mxu1 %v814_v15 }
 0x259   : > { %v735_v22 = vpop.permute.xlu1 %734  ;;  %1949 = vmatprep.subr.mxu1 %v2358_v0  ;;  %v792_v26 = vrot.slane %v727_v13, 4 }
 0x25a   : > { %v737_v27 = vsel %vm736_vm13, %v733_v20, %v735_v22 }
 0x25b   : > { %v739_v28 = vmul.f32 %v737_v27, %v2785_v17  ;;  %v809_v43 = vsel %vm808_vm9, %v807_v37, %v792_v26 }
 0x25d   : > { %v795_v33 = vrot.slane %v739_v28, 2 }
 0x25e   : > { %v524_v40 = vpop.permute.xlu0 %523 }
 0x25f   : > { %v613_v47 = vadd.f32 %v2698_v18, %v524_v40  ;;  %v811_v48 = vsel %vm810_vm12, %v809_v43, %v795_v33  ;;  %v644_v18 = vrot.slane %v642_v42, 4 }
 0x260   : > { %1950 = vmatpush3.msra.mxu1 %v811_v48 }
 0x261   : > { %v622_v14 = vmax.f32 %v613_v47, 0.0  ;;  %1952 = vmatmul.mubr.msk.f32.vlgmr.msra.gmra.mxu1 %vm816_vm14, %v689_v44  ;;  %1954 = vmatprep.subr.mxu1 %v2358_v0  ;;  %v646_v58 = vadd.f32 %v644_v18, %v637_v53  ;;  %v507_v47 = vld [vmem:[#allocation11] sm:$0xff] }
 0x262   : > { %1960 = vmatprep.mubr.msk.f32.mxu1 %vm2359_vm0, %v2358_v0  ;;  %v2877_v48 = vrot.slane %v507_v47, %v2716_v30 }
 0x263   : > { %v651_v56 = vmul.f32 %v2810_v45, %v622_v14  ;;  %v666_v60 = vmul.f32 %v2817_v51, %v622_v14  ;;  %v660_v8 = vmul.f32 %v2824_v29, %v622_v14  ;;  %v675_v10 = vmul.f32 %v2829_v57, %v622_v14 }
 0x265   : > { %v653_v59 = vrot.slane %v651_v56, 6  ;;  %v668_v11 = vrot.slane %v666_v60, 2  ;;  %v677_v22 = vrot.slane %v675_v10, 4  ;;  %v2881_v56 = vrot.slane %v507_v47, %v2719_v32  ;;  %v2891_v10 = vld [vmem:[#allocation11 + $0x8] ss:$0 sm:$0xff] }
 0x266   : > { %v529_v4 = vpop.permute.xlu1 %528  ;;  %v2894_v32 = vrot.slane %v507_v47, %v2738_v46 }
 0x267   : > { %v655_v7 = vadd.f32 %v653_v59, %v646_v58  ;;  %v618_v9 = vadd.f32 %v2707_v21, %v529_v4  ;;  %v2885_v59 = vrot.slane %v507_v47, %v2722_v34 }
 0x269   : > { %v623_v13 = vmax.f32 %v618_v9, 0.0  ;;  %v661_v15 = vadd.f32 %v660_v8, %v655_v7 }
 0x26b   : > { %v684_v19 = vmul.f32 %v2834_v61, %v623_v13  ;;  %v670_v20 = vadd.f32 %v668_v11, %v661_v15 }
 0x26d   : > { %v686_v23 = vrot.slane %v684_v19, 6  ;;  %v679_v26 = vadd.f32 %v677_v22, %v670_v20 }
 0x26f   : > { %v688_v27 = vadd.f32 %v686_v23, %v679_v26  ;;  %v2900_v26 = vrot.slane %v507_v47, %v2743_v49 }
 0x271   : > { %v1145_v28 = vrot.slane %v688_v27, 2 }
 0x273   : > { %1146 = vrot.lane.b32.xlu0 %v1145_v28, %s2361_s26 }
 0x2e5   : > { %v1147_v31 = vpop.permute.xlu0 %1146 }
 0x2e6   : > { %v2842_v33 = vsel %vm694_vm2, 0.0, %v1147_v31  ;;  %v1150_v21 = vsel %vm694_vm2, %v1147_v31, 0.0 }
 0x2e7   : > { %1197 = vrot.lane.b32.xlu0 %v1150_v21, %s2363_s29  ;;  %1195 = vrot.lane.b32.xlu1 %v2842_v33, %s2363_s29 }
 0x2eb   : > { %1208 = vrot.lane.b32.xlu0 %v1150_v21, %s2362_s19  ;;  %1206 = vrot.lane.b32.xlu1 %v2842_v33, %s2362_s19 }
 0x2ef   : > { %1164 = vrot.lane.b32.xlu0 %v1150_v21, %s2364_s10  ;;  %1162 = vrot.lane.b32.xlu1 %v2842_v33, %s2364_s10 }
 0x2f3   : > { %1219 = vrot.lane.b32.xlu0 %v1150_v21, %s2365_s23  ;;  %1217 = vrot.lane.b32.xlu1 %v2842_v33, %s2365_s23 }
 0x2f7   : > { %1230 = vrot.lane.b32.xlu0 %v1150_v21, %s2366_s20  ;;  %1228 = vrot.lane.b32.xlu1 %v2842_v33, %s2366_s20 }
 0x2fb   : > { %1175 = vrot.lane.b32.xlu0 %v1150_v21, %s2367_s3  ;;  %1173 = vrot.lane.b32.xlu1 %v2842_v33, %s2367_s3 }
 0x2ff   : > { %1186 = vrot.lane.b32.xlu0 %v1150_v21, %s2368_s7  ;;  %1184 = vrot.lane.b32.xlu1 %v2842_v33, %s2368_s7 }
 0x321   : > { %v2870_v37 = vpop.f32.mrf.mxu1 }
 0x322   : > { %v894_v38 = vmax.f32 %v2870_v37, 0.0 }
 0x323   : > { %v1953_v40 = vpop.f32.mrf.mxu1 }
 0x324   : > { %897 = vrot.lane.b32.xlu1 %v894_v38, %s2361_s26 }
 0x359   : > { %v1198_v42 = vpop.permute.xlu0 %1197  ;;  %v1196_v43 = vpop.permute.xlu1 %1195 }
 0x35a   : > { %v1199_v18 = vsel %vm748_vm3, %v1196_v43, %v1198_v42 }
 0x35b   : > { %v1201_v60 = vmul.f32 %v1199_v18, %v2877_v48 }
 0x35d   : > { %v1209_v44 = vpop.permute.xlu0 %1208  ;;  %v1207_v16 = vpop.permute.xlu1 %1206  ;;  %v1246_v11 = vrot.slane %v1201_v60, 6 }
 0x35e   : > { %v1210_v58 = vsel %vm760_vm4, %v1207_v16, %v1209_v44  ;;  %v2912_v44 = vrot.slane %v507_v47, %v2762_v62  ;;  %v2915_v16 = vrot.slane %v507_v47, %v2765_v63 }
 0x35f   : > { %v1212_v8 = vmul.f32 %v1210_v58, %v2881_v56  ;;  %v1257_v35 = vsel %vm806_vm8, %v1145_v28, %v1246_v11 }
 0x361   : > { %v1165_v14 = vpop.permute.xlu0 %1164  ;;  %v1163_v53 = vpop.permute.xlu1 %1162  ;;  %v1249_v34 = vrot.slane %v1212_v8, 4 }
 0x362   : > { %v1166_v19 = vsel %vm712_vm6, %v1163_v53, %v1165_v14 }
 0x363   : > { %v1168_v27 = vmul.f32 %v1166_v19, %v2894_v32  ;;  %v1258_v42 = vsel %vm808_vm9, %v1257_v35, %v1249_v34 }
 0x365   : > { %v1220_v4 = vpop.permute.xlu0 %1219  ;;  %v1218_v7 = vpop.permute.xlu1 %1217  ;;  %v1236_v28 = vrot.slane %v1168_v27, 6 }
 0x366   : > { %v1221_v30 = vsel %vm772_vm5, %v1218_v7, %v1220_v4  ;;  %v1155_v4 = vmul.f32 %v2915_v16, %v2842_v33 }
 0x367   : > { %v1223_v9 = vmul.f32 %v1221_v30, %v2885_v59  ;;  %v1143_v30 = vld [vmem:[%s3136_s6 + $0x8] sm:$0xff] }
 0x368   : > { %v1254_v62 = vsel %vm806_vm8, %v1155_v4, %v1236_v28 }
 0x369   : > { %v1231_v13 = vpop.permute.xlu0 %1230  ;;  %v1229_v15 = vpop.permute.xlu1 %1228  ;;  %v1252_v22 = vrot.slane %v1223_v9, 2 }
 0x36a   : > { %v1232_v20 = vsel %vm784_vm7, %v1229_v15, %v1231_v13 }
 0x36b   : > { %v1234_v23 = vmul.f32 %v2891_v10, %v1232_v20  ;;  %v1259_v49 = vsel %vm810_vm12, %v1258_v42, %v1252_v22 }
 0x36d   : > { %v1176_v31 = vpop.permute.xlu0 %1175  ;;  %v1174_v21 = vpop.permute.xlu1 %1173  ;;  %v1260_v46 = vsel %vm806_vm8, %v1234_v23, 1.0 }
 0x36e   : > { %v1177_v40 = vsel %vm724_vm10, %v1174_v21, %v1176_v31  ;;  %1968 = vmatprep.subr.msk.mxu0 %vm820_vm11, %v1260_v46 }
 0x36f   : > { %v1179_v43 = vmul.f32 %v1177_v40, %v2900_v26  ;;  %1969 = vmatpush3.msk.msra.mxu0 %vm820_vm11, %v1260_v46 }
 0x370   : > { %1970 = vmatprep.subr.mxu0 %v1259_v49 }
 0x371   : > { %v1187_v14 = vpop.permute.xlu0 %1186  ;;  %1971 = vmatpush3.msra.mxu0 %v1259_v49  ;;  %v1185_v53 = vpop.permute.xlu1 %1184  ;;  %v1239_v18 = vrot.slane %v1179_v43, 4 }
 0x372   : > { %v1188_v58 = vsel %vm736_vm13, %v1185_v53, %v1187_v14 }
 0x373   : > { %v1190_v60 = vmul.f32 %v1188_v58, %v2912_v44  ;;  %v1255_v8 = vsel %vm808_vm9, %v1254_v62, %v1239_v18 }
 0x375   : > { %v1242_v7 = vrot.slane %v1190_v60, 2 }
 0x377   : > { %v1256_v47 = vsel %vm810_vm12, %v1255_v8, %v1242_v7 }
 0x378   : > { %1972 = vmatprep.subr.mxu0 %v1256_v47 }
 0x379   : > { %1973 = vmatpush3.msra.mxu0 %v1256_v47 }
 0x37a   : > { %1975 = vmatmul.mubr.msk.f32.vlgmr.msra.gmra.mxu0 %vm816_vm14, %v1143_v30  ;;  %1986 = vmatprep.subr.mxu0 %v2358_v0 }
 0x37b   : > { %1988 = vmatprep.mubr.msk.f32.mxu0 %vm2359_vm0, %v2358_v0 }
 0x396   : > { %v898_v33 = vpop.permute.xlu1 %897 }
 0x397   : > { %v900_v9 = vsel %vm694_vm2, 0.0, %v898_v33  ;;  %v901_v11 = vsel %vm694_vm2, %v898_v33, 0.0 }
 0x398   : > { %928 = vrot.lane.b32.xlu1 %v901_v11, %s2363_s29  ;;  %926 = vrot.lane.b32.xlu0 %v900_v9, %s2363_s29 }
 0x39c   : > { %935 = vrot.lane.b32.xlu1 %v901_v11, %s2362_s19  ;;  %933 = vrot.lane.b32.xlu0 %v900_v9, %s2362_s19 }
 0x3a0   : > { %907 = vrot.lane.b32.xlu1 %v901_v11, %s2364_s10  ;;  %905 = vrot.lane.b32.xlu0 %v900_v9, %s2364_s10 }
 0x3a4   : > { %942 = vrot.lane.b32.xlu1 %v901_v11, %s2365_s23  ;;  %940 = vrot.lane.b32.xlu0 %v900_v9, %s2365_s23 }
 0x3a8   : > { %949 = vrot.lane.b32.xlu1 %v901_v11, %s2366_s20  ;;  %947 = vrot.lane.b32.xlu0 %v900_v9, %s2366_s20 }
 0x3ac   : > { %914 = vrot.lane.b32.xlu1 %v901_v11, %s2367_s3  ;;  %912 = vrot.lane.b32.xlu0 %v900_v9, %s2367_s3 }
 0x3b0   : > { %921 = vrot.lane.b32.xlu1 %v901_v11, %s2368_s7  ;;  %919 = vrot.lane.b32.xlu0 %v900_v9, %s2368_s7  ;;  %v902_v11 = vmul.f32 %v900_v9, %v2779_v12 }
 0x40a   : > { %v929_v13 = vpop.permute.xlu1 %928  ;;  %v927_v15 = vpop.permute.xlu0 %926 }
 0x40b   : > { %v930_v23 = vsel %vm748_vm3, %v927_v15, %v929_v13 }
 0x40c   : > { %v932_v31 = vmul.f32 %v930_v23, %v2725_v36 }
 0x40e   : > { %v936_v34 = vpop.permute.xlu1 %935  ;;  %v934_v19 = vpop.permute.xlu0 %933  ;;  %v964_v43 = vrot.slane %v932_v31, 6 }
 0x40f   : > { %v937_v27 = vsel %vm760_vm4, %v934_v19, %v936_v34  ;;  %v895_v19 = vld [vmem:[#allocation7] sm:$0x3] }
 0x410   : > { %v939_v35 = vmul.f32 %v937_v27, %v2729_v39  ;;  %v975_v36 = vsel %vm806_vm8, %v894_v38, %v964_v43 }
 0x412   : > { %v908_v20 = vpop.permute.xlu1 %907  ;;  %v906_v22 = vpop.permute.xlu0 %905  ;;  %v967_v14 = vrot.slane %v939_v35, 4 }
 0x413   : > { %v909_v53 = vsel %vm712_vm6, %v906_v22, %v908_v20 }
 0x414   : > { %v911_v39 = vmul.f32 %v909_v53, %v2748_v52  ;;  %v976_v8 = vsel %vm808_vm9, %v975_v36, %v967_v14 }
 0x416   : > { %v943_v21 = vpop.permute.xlu1 %942  ;;  %v941_v46 = vpop.permute.xlu0 %940  ;;  %v955_v37 = vrot.slane %v911_v39, 6 }
 0x417   : > { %v944_v40 = vsel %vm772_vm5, %v941_v46, %v943_v21 }
 0x418   : > { %v946_v42 = vmul.f32 %v944_v40, %v2733_v41  ;;  %v972_v15 = vsel %vm806_vm8, %v902_v11, %v955_v37 }
 0x41a   : > { %v950_v49 = vpop.permute.xlu1 %949  ;;  %v948_v28 = vpop.permute.xlu0 %947  ;;  %v970_v58 = vrot.slane %v946_v42, 2 }
 0x41b   : > { %v951_v18 = vsel %vm784_vm7, %v948_v28, %v950_v49 }
 0x41c   : > { %v953_v60 = vmul.f32 %v2745_v50, %v951_v18  ;;  %v977_v50 = vsel %vm810_vm12, %v976_v8, %v970_v58 }
 0x41e   : > { %v978_v4 = vsel %vm806_vm8, %v953_v60, 1.0  ;;  %v915_v41 = vpop.permute.xlu1 %914  ;;  %v913_v7 = vpop.permute.xlu0 %912 }
 0x41f   : > { %v916_v62 = vsel %vm724_vm10, %v913_v7, %v915_v41  ;;  %1955 = vmatpush3.msk.msra.mxu1 %vm820_vm11, %v978_v4 }
 0x420   : > { %v918_v47 = vmul.f32 %v916_v62, %v2751_v54  ;;  %1956 = vmatprep.subr.mxu1 %v2358_v0 }
 0x421   : > { %1957 = vmatpush3.msra.mxu1 %v977_v50 }
 0x422   : > { %v922_v38 = vpop.permute.xlu1 %921  ;;  %v920_v52 = vpop.permute.xlu0 %919  ;;  %1958 = vmatprep.subr.mxu1 %v2358_v0  ;;  %v958_v30 = vrot.slane %v918_v47, 4 }
 0x423   : > { %v923_v33 = vsel %vm736_vm13, %v920_v52, %v922_v38  ;;  %v1056_v38 = vld [vmem:[%s3135_s5] sm:$0x1] }
 0x424   : > { %v925_v13 = vmul.f32 %v923_v33, %v2785_v17  ;;  %v973_v34 = vsel %vm808_vm9, %v972_v15, %v958_v30  ;;  %v1380_v30 = vld [vmem:[#allocation8] sm:$0xff] }
 0x426   : > { %v961_v54 = vrot.slane %v925_v13, 2 }
 0x428   : > { %v974_v20 = vsel %vm810_vm12, %v973_v34, %v961_v54 }
 0x429   : > { %1959 = vmatpush3.msra.mxu1 %v974_v20 }
 0x42a   : > { %1961 = vmatmul.mubr.msk.f32.vlgmr.msra.gmra.mxu1 %vm816_vm14, %v895_v19  ;;  %1963 = vmatprep.subr.mxu1 %v2358_v0 }
 0x42b   : > { %1965 = vmatprep.mubr.msk.f32.mxu1 %vm2359_vm0, %v2358_v0 }
 0x43a   : > { %v1976_v22 = vpop.f32.mrf.mxu0 }
 0x43b   : > { %v1346_v27 = vmax.f32 %v1976_v22, 0.0 }
 0x43c   : > { %v1336_v12 = vpop.f32.mrf.mxu0 }
 0x43d   : > { %v1345_v9 = vmax.f32 %v1336_v12, 0.0  ;;  %v1365_v42 = vmul.f32 %v1346_v27, %v2817_v51  ;;  %v1363_v0 = vmul.f32 %v1346_v27, %v2824_v29  ;;  %v1370_v14 = vmul.f32 %v1346_v27, %v2829_v57 }
 0x43e   : > { %v1375_v58 = vmul.f32 %v1346_v27, %v2834_v61 }
 0x43f   : > { %v1348_v17 = vmul.f32 %v1345_v9, %v2769_v1  ;;  %v1353_v23 = vmul.f32 %v1345_v9, %v2796_v25  ;;  %v1347_v31 = vmul.f32 %v1345_v9, %v2792_v24  ;;  %v1358_v46 = vmul.f32 %v1345_v9, %v2810_v45 }
 0x440   : > { %v1367_v53 = vrot.slane %v1365_v42, 2  ;;  %v1372_v36 = vrot.slane %v1370_v14, 4  ;;  %v1377_v4 = vrot.slane %v1375_v58, 6 }
 0x441   : > { %v1350_v21 = vrot.slane %v1348_v17, 2  ;;  %v1355_v40 = vrot.slane %v1353_v23, 4  ;;  %v1360_v49 = vrot.slane %v1358_v46, 6 }
 0x443   : > { %v1352_v35 = vadd.f32 %v1350_v21, %v1347_v31 }
 0x445   : > { %v1357_v43 = vadd.f32 %v1355_v40, %v1352_v35 }
 0x447   : > { %v1362_v28 = vadd.f32 %v1360_v49, %v1357_v43 }
 0x449   : > { %v1364_v18 = vadd.f32 %v1363_v0, %v1362_v28 }
 0x44b   : > { %v1369_v60 = vadd.f32 %v1367_v53, %v1364_v18 }
 0x44d   : > { %v1374_v39 = vadd.f32 %v1372_v36, %v1369_v60 }
 0x44f   : > { %v1379_v41 = vadd.f32 %v1377_v4, %v1374_v39 }
 0x451   : > { %1383 = vrot.lane.b32.xlu0 %v1379_v41, %s2361_s26 }
 0x4c3   : > { %v1384_v7 = vpop.permute.xlu0 %1383 }
 0x4c4   : > { %v2988_v62 = vsel %vm694_vm2, 0.0, %v1384_v7  ;;  %v1387_v8 = vsel %vm694_vm2, %v1384_v7, 0.0 }
 0x4c5   : > { %1414 = vrot.lane.b32.xlu0 %v1387_v8, %s2363_s29  ;;  %1412 = vrot.lane.b32.xlu1 %v2988_v62, %s2363_s29  ;;  %s1866_s29 = sshll.u32 %s2611_s15, 6 }
 0x4c9   : > { %1421 = vrot.lane.b32.xlu0 %v1387_v8, %s2362_s19  ;;  %1419 = vrot.lane.b32.xlu1 %v2988_v62, %s2362_s19 }
 0x4cd   : > { %1393 = vrot.lane.b32.xlu0 %v1387_v8, %s2364_s10  ;;  %1391 = vrot.lane.b32.xlu1 %v2988_v62, %s2364_s10  ;;  %s3051_s10 = scalar_lea.vmem [#allocation13], %s1866_s29 }
 0x4d1   : > { %1428 = vrot.lane.b32.xlu0 %v1387_v8, %s2365_s23  ;;  %1426 = vrot.lane.b32.xlu1 %v2988_v62, %s2365_s23 }
 0x4d5   : > { %1435 = vrot.lane.b32.xlu0 %v1387_v8, %s2366_s20  ;;  %1433 = vrot.lane.b32.xlu1 %v2988_v62, %s2366_s20 }
 0x4d9   : > { %1400 = vrot.lane.b32.xlu0 %v1387_v8, %s2367_s3  ;;  %1398 = vrot.lane.b32.xlu1 %v2988_v62, %s2367_s3  ;;  %s1898_s3 = sshll.u32 %s2458_s27, 10  ;;  %s1714_s27 = scalar_lea.sflag [#allocation4], %s2611_s15 }
 0x4da   : > { %s3081_s9 = scalar_lea.hbm %s3142_s12, %s1898_s3 }
 0x4dd   : > { %1407 = vrot.lane.b32.xlu0 %v1387_v8, %s2368_s7  ;;  %1405 = vrot.lane.b32.xlu1 %v2988_v62, %s2368_s7  ;;  %s1727_s7 = sshll.u32 %s3051_s10, 4  ;;  %s3083_s7 = int_to_ptr.vmem [resolvable:$true] %s1727_s7 }
 0x4de   : > { %p2279_p5 = scmp.lt.s32.totalorder %s3083_s7, %s2277_s17 }
 0x4ea   : > { %v1051_v47 = vpop.f32.mrf.mxu1 }
 0x4eb   : > { %v1055_v50 = vmax.f32 %v1051_v47, 0.0 }
 0x4ec   : > { %v1962_v37 = vpop.f32.mrf.mxu1 }
 0x4ed   : > { %v1057_v52 = vsel %vm806_vm8, %v1055_v50, 1.0  ;;  %v1381_v50 = vld [vmem:[#allocation8 + $0x8] sm:$0xff] }
 0x4ee   : > { %1964 = vmatpush3.msk.msra.mxu1 %vm820_vm11, %v1057_v52 }
 0x4ef   : > { %1966 = vmatmul.mubr.msk.f32.vlgmr.msra.gmra.mxu1 %vm1058_vm15, %v1056_v38 }
 0x4f0   : > { %1983 = vmatprep.mubr.msk.f32.mxu1 %vm816_vm14, %v1380_v30 }
 0x537   : > { %v1415_v33 = vpop.permute.xlu0 %1414  ;;  %v1413_v11 = vpop.permute.xlu1 %1412 }
 0x538   : > { %v1416_v19 = vsel %vm748_vm3, %v1413_v11, %v1415_v33 }
 0x539   : > { %v1418_v22 = vmul.f32 %v1416_v19, %v2877_v48 }
 0x53b   : > { %v1422_v13 = vpop.permute.xlu0 %1421  ;;  %v1420_v15 = vpop.permute.xlu1 %1419  ;;  %v1450_v31 = vrot.slane %v1418_v22, 6 }
 0x53c   : > { %v1423_v20 = vsel %vm760_vm4, %v1420_v15, %v1422_v13 }
 0x53d   : > { %v1425_v17 = vmul.f32 %v1423_v20, %v2881_v56  ;;  %v1461_v14 = vsel %vm806_vm8, %v1379_v41, %v1450_v31  ;;  %v1388_v41 = vmul.f32 %v2988_v62, %v2915_v16 }
 0x53f   : > { %v1394_v54 = vpop.permute.xlu0 %1393  ;;  %v1392_v34 = vpop.permute.xlu1 %1391  ;;  %v1453_v35 = vrot.slane %v1425_v17, 4 }
 0x540   : > { %v1395_v40 = vsel %vm712_vm6, %v1392_v34, %v1394_v54 }
 0x541   : > { %v1397_v48 = vmul.f32 %v1395_v40, %v2894_v32  ;;  %v1462_v53 = vsel %vm808_vm9, %v1461_v14, %v1453_v35 }
 0x543   : > { %v1429_v12 = vpop.permute.xlu0 %1428  ;;  %v1427_v9 = vpop.permute.xlu1 %1426  ;;  %v1441_v32 = vrot.slane %v1397_v48, 6 }
 0x544   : > { %v1430_v23 = vsel %vm772_vm5, %v1427_v9, %v1429_v12 }
 0x545   : > { %v1432_v27 = vmul.f32 %v1430_v23, %v2885_v59 }
 0x547   : > { %v1436_v21 = vpop.permute.xlu0 %1435  ;;  %v1434_v46 = vpop.permute.xlu1 %1433  ;;  %v1456_v43 = vrot.slane %v1432_v27, 2 }
 0x548   : > { %v1437_v42 = vsel %vm784_vm7, %v1434_v46, %v1436_v21 }
 0x549   : > { %v1439_v49 = vmul.f32 %v2891_v10, %v1437_v42  ;;  %v1463_v10 = vsel %vm810_vm12, %v1462_v53, %v1456_v43 }
 0x54b   : > { %v1401_v0 = vpop.permute.xlu0 %1400  ;;  %v1399_v28 = vpop.permute.xlu1 %1398  ;;  %v1464_v56 = vsel %vm806_vm8, %v1439_v49, 1.0 }
 0x54c   : > { %v1402_v59 = vsel %vm724_vm10, %v1399_v28, %v1401_v0  ;;  %1977 = vmatprep.subr.msk.mxu1 %vm820_vm11, %v1464_v56 }
 0x54d   : > { %v1404_v18 = vmul.f32 %v1402_v59, %v2900_v26  ;;  %1978 = vmatpush3.msk.msra.mxu1 %vm820_vm11, %v1464_v56  ;;  %v1458_v26 = vsel %vm806_vm8, %v1388_v41, %v1441_v32 }
 0x54e   : > { %1979 = vmatprep.subr.mxu1 %v1463_v10 }
 0x54f   : > { %v1408_v58 = vpop.permute.xlu0 %1407  ;;  %1980 = vmatpush3.msra.mxu1 %v1463_v10  ;;  %v1406_v60 = vpop.permute.xlu1 %1405  ;;  %v1444_v36 = vrot.slane %v1404_v18, 4 }
 0x550   : > { %v1409_v39 = vsel %vm736_vm13, %v1406_v60, %v1408_v58 }
 0x551   : > { %v1411_v4 = vmul.f32 %v1409_v39, %v2912_v44  ;;  %v1459_v8 = vsel %vm808_vm9, %v1458_v26, %v1444_v36 }
 0x553   : > { %v1447_v7 = vrot.slane %v1411_v4, 2 }
 0x555   : > { %v1460_v47 = vsel %vm810_vm12, %v1459_v8, %v1447_v7 }
 0x556   : > { %1981 = vmatprep.subr.mxu1 %v1460_v47 }
 0x557   : > { %1982 = vmatpush3.msra.mxu1 %v1460_v47 }
 0x558   : > { %1984 = vmatmul.mubr.msk.f32.vlgmr.msra.gmra.mxu1 %vm816_vm14, %v1381_v50 }
 0x5af   : > { %v1131_v37 = vpop.f32.mrf.mxu1 }
 0x5b0   : > { %v1877_v38 = vmul.f32 -1.442695, %v1131_v37 }
 0x5b1   : > { %v1967_v52 = vpop.f32.mrf.mxu1 }
 0x5b2   : > { %2105 = vpow2.f32 %v1877_v38 }
 0x5bf   : > { %v2106_v44 = vpop.eup %2105 }
 0x5c0   : > { %v1138_v30 = vadd.f32 1.0, %v2106_v44  ;;  %v2113_v44 = vld [vmem:[%s2615_s30 + $0x18] sm:$0xff]  ;;  %s2272_s30 = scalar_lea.vmem %s3083_s7, 1024 }
 0x5c1   : > { %p2273_p11 = scmp.ne.s32.totalorder %s3083_s7, %s2272_s30  ;;  %p2280_p9 = scmp.lt.s32.totalorder %s2278_s18, %s2272_s30 }
 0x5c2   : > { %2107 = vrcp.f32 %v1138_v30 }
 0x5c3   : > { %p2274_p0 = pnand %p2273_p11, %p3180_p10  ;;  %p2281_p1 = por %p2280_p9, %p2279_p5 }
 0x5c5   : > { %p2275_p13 = pneg %p2274_p0 }
 0x5c7   : > { %p2282_p3 = pnand %p2281_p1, %p2275_p13 }
 0x5cf   : > { %v2108_v16 = vpop.eup %2107 }
 0x5d0   : > { %v1141_v62 = vadd.f32 1.0, %v2108_v16 }
 0x5d2   : > { %v1679_v33 = vrot.slane %v1141_v62, %v2765_v63 }
 0x5d4   : > { %v1680_v11 = vmul.f32 %v1679_v33, %v2656_v6  ;;  %v1681_v13 = vmul.f32 %v1679_v33, %v2651_v5  ;;  %v1682_v15 = vmul.f32 %v1679_v33, %v2643_v3  ;;  %v1683_v54 = vmul.f32 %v1679_v33, %v2640_v2 }
 0x5d6   : > { %v1684_v34 = vmul.f32 0.01, %v1680_v11  ;;  %v1685_v19 = vmul.f32 0.01, %v1681_v13  ;;  %v1686_v20 = vmul.f32 0.01, %v1682_v15 }
 0x5d7   : > { %v1687_v22 = vmul.f32 0.01, %v1683_v54 }
 0x5d8   : > { %v1688_v12 = vmax.f32 %v1680_v11, %v1684_v34  ;;  %v1689_v9 = vmax.f32 %v1681_v13, %v1685_v19  ;;  %v1690_v17 = vmax.f32 %v1682_v15, %v1686_v20 }
 0x5d9   : > { %v1691_v23 = vmax.f32 %v1683_v54, %v1687_v22 }
 0x5da   : > { %1692 = vst [vmem:[%s3051_s10] sm:$0xff] %v1688_v12  ;;  %1693 = vst [vmem:[%s3051_s10 + $0x8] sm:$0xff] %v1689_v9 }
 0x5db   : > { %1694 = vst [vmem:[%s3051_s10 + $0x10] sm:$0xff] %v1690_v17  ;;  %1695 = vst [vmem:[%s3051_s10 + $0x18] sm:$0xff] %v1691_v23 }
 0x618   : > { %v1985_v63 = vpop.f32.mrf.mxu1 }
 0x619   : > { %v1550_v46 = vmax.f32 %v1985_v63, 0.0 }
 0x61a   : > { %v1540_v2 = vpop.f32.mrf.mxu1 }
 0x61b   : > { %v1549_v27 = vmax.f32 %v1540_v2, 0.0  ;;  %v1569_v48 = vmul.f32 %v1550_v46, %v2817_v51  ;;  %v1567_v56 = vmul.f32 %v1550_v46, %v2824_v29  ;;  %v1574_v14 = vmul.f32 %v1550_v46, %v2829_v57  ;;  %v1584_v51 = vld [vmem:[%s3138_s8] sm:$0xff] }
 0x61d   : > { %v1552_v31 = vmul.f32 %v1549_v27, %v2769_v1  ;;  %v1557_v21 = vmul.f32 %v1549_v27, %v2796_v25  ;;  %v1551_v35 = vmul.f32 %v1549_v27, %v2792_v24  ;;  %v1562_v42 = vmul.f32 %v1549_v27, %v2810_v45 }
 0x61e   : > { %v1571_v1 = vrot.slane %v1569_v48, 2  ;;  %v1579_v25 = vmul.f32 %v1550_v46, %v2834_v61  ;;  %v1576_v18 = vrot.slane %v1574_v14, 4 }
 0x61f   : > { %v1554_v40 = vrot.slane %v1552_v31, 2  ;;  %v1559_v49 = vrot.slane %v1557_v21, 4  ;;  %v1564_v28 = vrot.slane %v1562_v42, 6 }
 0x620   : > { %v1581_v10 = vrot.slane %v1579_v25, 6 }
 0x621   : > { %v1556_v43 = vadd.f32 %v1554_v40, %v1551_v35 }
 0x623   : > { %v1561_v0 = vadd.f32 %v1559_v49, %v1556_v43 }
 0x625   : > { %v1566_v59 = vadd.f32 %v1564_v28, %v1561_v0 }
 0x627   : > { %v1568_v53 = vadd.f32 %v1567_v56, %v1566_v59 }
 0x629   : > { %v1573_v24 = vadd.f32 %v1571_v1, %v1568_v53 }
 0x62b   : > { %v1578_v32 = vadd.f32 %v1576_v18, %v1573_v24 }
 0x62d   : > { %v1583_v45 = vadd.f32 %v1581_v10, %v1578_v32 }
 0x62f   : > { %v1585_v58 = vsel %vm806_vm8, %v1583_v45, 1.0 }
 0x630   : > { %1987 = vmatpush3.msk.msra.mxu0 %vm820_vm11, %v1585_v58 }
 0x631   : > { %1989 = vmatmul.mubr.msk.f32.vlgmr.msra.gmra.mxu0 %vm1058_vm15, %v1584_v51 }
 0x6f1   : > { %v1658_v29 = vpop.f32.mrf.mxu0 }
 0x6f2   : > { %v1662_v57 = vmul.f32 %v1658_v29, %v2756_v55 }
 0x6f3   : > { %v1990_v61 = vpop.f32.mrf.mxu0 }
 0x6f4   : > { %v1663_v60 = vrot.slane %v1662_v57, 4 }
 0x6f6   : > { %v1664_v36 = vadd.f32 %v1663_v60, %v1662_v57 }
 0x6f8   : > { %v1665_v39 = vrot.slane %v1664_v36, 2 }
 0x6fa   : > { %v1666_v4 = vadd.f32 %v1665_v39, %v1664_v36 }
 0x6fc   : > { %v1667_v41 = vrot.slane %v1666_v4, 1 }
 0x6fe   : > { %v1668_v7 = vadd.f32 %v1667_v41, %v1666_v4 }
 0x700   : > { %v1887_v26 = vmul.f32 -1.442695, %v1668_v7 }
 0x702   : > { %2109 = vpow2.f32 %v1887_v26 }
 0x70f   : > { %v2110_v8 = vpop.eup %2109 }
 0x710   : > { %v1672_v47 = vadd.f32 1.0, %v2110_v8 }
 0x712   : > { %2111 = vrcp.f32 %v1672_v47 }
 0x71f   : > { %v2112_v50 = vpop.eup %2111 }
 0x720   : > { %v1675_v37 = vadd.f32 1.0, %v2112_v50 }
 0x722   : > { %v1696_v38 = vmul.f32 %v1675_v37, %v2656_v6  ;;  %v1697_v55 = vmul.f32 %v1675_v37, %v2651_v5  ;;  %v1698_v52 = vmul.f32 %v1675_v37, %v2643_v3  ;;  %v1699_v30 = vmul.f32 %v2113_v44, %v1675_v37 }
 0x724   : > { %v1700_v16 = vmul.f32 0.01, %v1696_v38  ;;  %v1701_v62 = vmul.f32 0.01, %v1697_v55  ;;  %v1702_v33 = vmul.f32 0.01, %v1698_v52 }
 0x725   : > { %v1703_v11 = vmul.f32 0.01, %v1699_v30 }
 0x726   : > { %v1704_v13 = vmax.f32 %v1696_v38, %v1700_v16  ;;  %v1705_v6 = vmax.f32 %v1697_v55, %v1701_v62  ;;  %v1706_v15 = vmax.f32 %v1698_v52, %v1702_v33 }
 0x727   : > { %v1707_v3 = vmax.f32 %v1699_v30, %v1703_v11 }
 0x728   : > { %1888 = vst [vmem:[%s3051_s10 + $0x20] sm:$0xff] %v1704_v13  ;;  %1889 = vst [vmem:[%s3051_s10 + $0x28] sm:$0xff] %v1705_v6 }
 0x729   : > { %1890 = vst [vmem:[%s3051_s10 + $0x30] sm:$0xff] %v1706_v15  ;;  %1891 = vst [vmem:[%s3051_s10 + $0x38] sm:$0xff] %v1707_v3 }
 0x72a   : > { %2285 = shalt.err (!%p2282_p3)
}
 0x72b   : > { %s2286_s26 = scalar_lea.hbm %s3081_s9, 1024  ;;  %s2290_s10 = scalar_lea.hbm %s3142_s12, 2048 }
 0x72c   : > { %p2287_p4 = scmp.ne.s32.totalorder %s3081_s9, %s2286_s26  ;;  %p2291_p2 = scmp.lt.s32.totalorder %s3081_s9, %s3142_s12 }
 0x72d   : > { %p2292_p7 = scmp.lt.s32.totalorder %s2290_s10, %s2286_s26 }
 0x72e   : > { %p2288_p12 = pnand %p2287_p4, %p3180_p10 }
 0x72f   : > { %p2293_p8 = por %p2292_p7, %p2291_p2 }
 0x730   : > { %p2289_p6 = pneg %p2288_p12 }
 0x732   : > { %p2294_p11 = pnand %p2293_p8, %p2289_p6 }
 0x734   : > { %2297 = shalt.err (!%p2294_p11)
}
 0x735   : > { %s2370_s3 = smov 128   ;;  %s2371_s13 = smov 8  }
 0x736   : > { %2013 = dma.vmem_to_hbm [thread:$0]  (%p3180_p10), %s3083_s7, 1024, %s3081_s9, %s1714_s27, %s2370_s3, %s2370_s3, %s2371_s13  }
 0x737 PF: > { %s1742_s4 = sand.u32 1, %s2336_s21   ;;  %p3181_p0 = scmp.ne.s32.totalorder %s3169_s25, 0 }
 0x738   : > { %p3182_p13 = scmp.ge.s32.totalorder %s2348_s24, 2  ;;  %s1743_s30 = scalar_lea.sflag [#allocation4], %s1742_s4 }
 0x73a   : > { %p2036_p5 = pnand %p3182_p13, %p3181_p0 }
 0x73c   : > { %p2037_p9 = pneg %p2036_p5 }
 0x73e   : > { %2331 = dma.done.wait (%p2037_p9), %s1743_s30, 1024  }
 0x73f   : > { %2333 = vsyncadd (%p2037_p9), %s1743_s30, 4294966272  ;;  %s3183_s28 = sld [smem:[#allocation19_spill]]  ;;  %p28_p1 = scmp.ge.s32.totalorder %s2542_s16, 4  }
 0x740   : > { %s3184_s23 = sld [smem:[#allocation20_spill]]  ;;  %s3185_s21 = smov %s2340_s22 }
 0x741   : > { %s3187_s24 = smov %s2542_s16  ;;  %30 = sbr.rel (!%p28_p1) target bundleno = 14 (0xe), region = 134 }
 0x745   : > { %s3186_s22 = smov %s3183_s28 }
 0x746   :  { %1748 = vsyncpa [#allocation3], 1 }
 0x747   :  { %1750 = vsyncpa [#allocation3 + $0x1], 1 }
 0x748   :  { %1751 = vsyncpa [#allocation6], 1 }
 0x749   :  { %1752 = vsyncpa [#allocation9], 1 }
 0x74a   :  { %1753 = vsyncpa [#allocation12], 1 }
 0x74b   :  { %1754 = vsyncpa [#allocation4], 1 }
 0x74c   :  { %1756 = vsyncpa [#allocation4 + $0x1], 1 }

</bundles_post_ra>
